<compile_context>
chip_gen: v7x
topology: tpu7x:2x2x1
jax: 0.10.0
libtpu: 0.0.40
codegen_flags: <defaults>
</compile_context>

<pallas_src>
import functools

import jax
import jax.numpy as jnp
from jax.experimental import pallas as pl
from jax.experimental.pallas import tpu as pltpu


def att_layer_kernel(embs_ref, v_ref, out_ref, *, num_embs):
    # embs_ref: (K, TN, D)   v_ref: (1, D)   out_ref: (TN, D)
    v = v_ref[...].astype(jnp.float32)                              # (1, D)

    # Pass 1: per-embedding unnormalized attention weights, kept as separate
    # (TN, 1) columns (avoids lane-narrow concatenate/slice).
    ws = []
    for k in range(num_embs):
        e = embs_ref[k].astype(jnp.float32)                         # (TN, D)
        ws.append(jnp.sum(e * v, axis=1, keepdims=True))            # (TN, 1)

    # Softmax across the K embeddings (dim=0 of the [K, N] stack), per row.
    m = ws[0]
    for k in range(1, num_embs):
        m = jnp.maximum(m, ws[k])
    ps = [jnp.exp(w - m) for w in ws]
    denom = ps[0]
    for k in range(1, num_embs):
        denom = denom + ps[k]
    # Exact divide: approx=True EUP reciprocal (~1e-3 rel. error) could exceed
    # the 3e-4 tolerance, and the kernel is DMA-bound so this costs nothing.
    inv = pl.reciprocal(denom, approx=False)

    # Pass 2: weighted mixture.  Re-read each embedding tile from VMEM instead
    # of holding all K f32 tiles in vregs (would spill at large tiles).
    acc = embs_ref[0].astype(jnp.float32) * ps[0]
    for k in range(1, num_embs):
        acc = acc + embs_ref[k].astype(jnp.float32) * ps[k]
    out_ref[...] = (acc * inv).astype(out_ref.dtype)


def _vmem_capacity_bytes():
    """Physical VMEM per TensorCore; conservative 64 MiB (v7x) if unknown."""
    try:
        cap = int(getattr(pltpu.get_tpu_info(), "vmem_capacity_bytes", 0))
        if cap > 0:
            return cap
    except Exception:
        pass
    return 64 << 20


def _pick_tile_n(n, d, k, itemsize, want, vmem_budget):
    """Largest row tile that (a) fits the double-buffered working set in the
    VMEM budget, (b) respects the sublane granule, and (c) keeps >= 2 grid
    steps so both v7x TensorCores get work.  Does NOT require tile | N — the
    edge block is masked by Pallas."""
    gran = 16 if itemsize == 2 else 8
    if n <= gran:
        return n
    want = max(gran, (int(want) // gran) * gran)
    # Per tile-row bytes: double-buffered (K inputs + 1 output) blocks plus a
    # few whole-tile f32 temporaries the compiler may materialize.
    per_row = 2 * (k + 1) * d * itemsize + 8 * d * 4
    tn_vmem = max(gran, (vmem_budget // per_row) // gran * gran)
    tn_half = max(gran, -(-pl.cdiv(n, 2) // gran) * gran)   # ceil(n/2) up to granule
    tn = max(gran, min(want, tn_vmem, tn_half))
    return min(tn, n)


def att_layer(embs, attention_mat, attention, *, tile_n=4096):
    """embs: [K, N, D] stacked embeddings. Returns mixed embeddings [N, D]."""
    K, N, D = embs.shape
    orig_d = D
    dtype = embs.dtype

    # Algebraic fold: attention_mat and attention collapse into one (1, D)
    # vector, computed once in full f32 precision in the wrapper.
    v = jnp.dot(attention_mat.astype(jnp.float32),
                attention.astype(jnp.float32).T,
                precision=jax.lax.Precision.HIGHEST).T              # (1, D)

    # Lane-density insurance: pad D to a multiple of 128 so loads/stores stay
    # unmasked.  Zero-padded columns contribute 0 to the row dot products and
    # produce 0 output columns (sliced off below).  No-op when D % 128 == 0.
    if D % 128 != 0:
        d_pad = -(-D // 128) * 128
        embs = jnp.pad(embs, ((0, 0), (0, 0), (0, d_pad - D)))
        v = jnp.pad(v, ((0, 0), (0, d_pad - D)))
        D = d_pad

    itemsize = jnp.dtype(dtype).itemsize
    vmem_cap = _vmem_capacity_bytes()
    # ~45% of physical VMEM for this kernel's blocks: ~28 MiB on v7x (64 MiB),
    # ~57 MiB on v5e/v6e (128 MiB).
    budget = int(vmem_cap * 0.45)
    tn = _pick_tile_n(N, D, K, itemsize, tile_n, budget)
    grid_n = pl.cdiv(N, tn)

    # Scoped-VMEM limit from the actual working set, clamped under physical.
    block_bytes = (K + 1) * tn * D * itemsize
    temps_bytes = 8 * tn * D * 4
    vmem_limit = max(16 << 20, 2 * block_bytes + temps_bytes + (4 << 20))
    vmem_limit = int(min(vmem_limit, vmem_cap - (2 << 20)))

    cost = pl.CostEstimate(
        flops=(5 * K + 2) * N * D,
        transcendentals=K * N,
        bytes_accessed=(K + 1) * N * D * itemsize + D * 4)

    kernel = functools.partial(att_layer_kernel, num_embs=K)
    out = pl.pallas_call(
        kernel,
        out_shape=jax.ShapeDtypeStruct((N, D), dtype),
        grid_spec=pltpu.PrefetchScalarGridSpec(
            num_scalar_prefetch=0,
            grid=(grid_n,),
            in_specs=[
                pl.BlockSpec((K, tn, D), lambda i: (0, i, 0)),
                pl.BlockSpec((1, D), lambda i: (0, 0)),
            ],
            out_specs=pl.BlockSpec((tn, D), lambda i: (i, 0)),
        ),
        compiler_params=pltpu.CompilerParams(
            dimension_semantics=("parallel",),
            vmem_limit_bytes=vmem_limit),
        cost_estimate=cost,
    )(embs, v)

    if orig_d != D:
        out = out[:, :orig_d]
    return out


def att_layer_ref(embs, attention_mat, attention):
    # Pure-JAX reference mirroring the PyTorch forward exactly (full precision).
    s = jnp.einsum('knd,de->kne', embs, attention_mat,
                   precision=jax.lax.Precision.HIGHEST)
    w = jnp.sum(attention[None] * s, axis=-1)             # (K, N)
    score = jax.nn.softmax(w, axis=0)                     # (K, N)
    return jnp.sum(embs * score[..., None], axis=0)       # (N, D)


if __name__ == "__main__":
    key = jax.random.PRNGKey(0)
    # 3 input embeddings; N deliberately NOT a multiple of the tile so the
    # pl.cdiv grid / masked edge-block path is exercised.
    K, N, D = 3, 520, 128

    k1, k2, k3 = jax.random.split(key, 3)
    # Deterministic "randn" init matching nn.Parameter(torch.randn(...)) shapes.
    attention_mat = jax.random.normal(k1, (D, D), dtype=jnp.float32)
    attention = jax.random.normal(k2, (1, D), dtype=jnp.float32)
    embs = jax.random.normal(k3, (K, N, D), dtype=jnp.float32)

    ref = att_layer_ref(embs, attention_mat, attention)

    # 1) Auto-selected tile (capped at ceil(N/2) -> 2-step grid at this demo N;
    #    at realistic N the generation-aware 4096-row target applies).
    out = jax.block_until_ready(att_layer(embs, attention_mat, attention))
    assert out.shape == (N, D)
    # Tolerance 3e-4: the algebraic fold e @ (A @ a.T) reassociates the f32
    # reduction vs. the reference sum((e@A)*a, axis=1).  Do not tighten.
    assert jnp.allclose(out, ref, atol=3e-4, rtol=3e-4), "mismatch (auto tile)"

    # 2) Small explicit tile: multi-step pipeline + masked partial edge block.
    out2 = jax.block_until_ready(
        att_layer(embs, attention_mat, attention, tile_n=128))
    assert jnp.allclose(out2, ref, atol=3e-4, rtol=3e-4), "mismatch (tile 128)"

    print("KERNEL_OK")
</pallas_src>

<mosaic_0001>
module attributes {stable_mosaic.version = 11 : i64} {
  func.func @att_layer_kernel(%arg0: i32, %arg1: memref<3x264x128xf32, #tpu.memory_space<vmem>>, %arg2: memref<1x128xf32, #tpu.memory_space<vmem>>, %arg3: memref<264x128xf32, #tpu.memory_space<vmem>>) attributes {dimension_semantics = [#tpu.dimension_semantics<parallel>], iteration_bounds = array<i64: 2>, scalar_prefetch = 0 : i64, scratch_operands = 0 : i64, tpu.core_type = #tpu.core_type<tc>, window_params = [{transform_indices = @transform_0, window_bounds = array<i64: 3, 264, 128>}, {pipeline_mode = #tpu.pipeline_mode<synchronous>, transform_indices = @transform_1, window_bounds = array<i64: 1, 128>}, {transform_indices = @transform_2, window_bounds = array<i64: 264, 128>}]} {
    %c0 = arith.constant 0 : index
    %c0_0 = arith.constant 0 : index
    %0 = vector.load %arg2[%c0, %c0_0] : memref<1x128xf32, #tpu.memory_space<vmem>>, vector<1x128xf32>
    %c0_1 = arith.constant 0 : index
    %c0_2 = arith.constant 0 : index
    %c0_3 = arith.constant 0 : index
    %1 = vector.load %arg1[%c0_1, %c0_2, %c0_3] : memref<3x264x128xf32, #tpu.memory_space<vmem>>, vector<1x264x128xf32>
    %2 = vector.shape_cast %1 : vector<1x264x128xf32> to vector<264x128xf32>
    %3 = vector.broadcast %0 : vector<1x128xf32> to vector<264x128xf32>
    %4 = arith.mulf %2, %3 : vector<264x128xf32>
    %cst = arith.constant dense<0.000000e+00> : vector<264xf32>
    %5 = vector.multi_reduction <add>, %4, %cst [1] : vector<264x128xf32> to vector<264xf32>
    %6 = vector.shape_cast %5 : vector<264xf32> to vector<264x1xf32>
    %c1 = arith.constant 1 : index
    %c0_4 = arith.constant 0 : index
    %c0_5 = arith.constant 0 : index
    %7 = vector.load %arg1[%c1, %c0_4, %c0_5] : memref<3x264x128xf32, #tpu.memory_space<vmem>>, vector<1x264x128xf32>
    %8 = vector.shape_cast %7 : vector<1x264x128xf32> to vector<264x128xf32>
    %9 = vector.broadcast %0 : vector<1x128xf32> to vector<264x128xf32>
    %10 = arith.mulf %8, %9 : vector<264x128xf32>
    %cst_6 = arith.constant dense<0.000000e+00> : vector<264xf32>
    %11 = vector.multi_reduction <add>, %10, %cst_6 [1] : vector<264x128xf32> to vector<264xf32>
    %12 = vector.shape_cast %11 : vector<264xf32> to vector<264x1xf32>
    %c2 = arith.constant 2 : index
    %c0_7 = arith.constant 0 : index
    %c0_8 = arith.constant 0 : index
    %13 = vector.load %arg1[%c2, %c0_7, %c0_8] : memref<3x264x128xf32, #tpu.memory_space<vmem>>, vector<1x264x128xf32>
    %14 = vector.shape_cast %13 : vector<1x264x128xf32> to vector<264x128xf32>
    %15 = vector.broadcast %0 : vector<1x128xf32> to vector<264x128xf32>
    %16 = arith.mulf %14, %15 : vector<264x128xf32>
    %cst_9 = arith.constant dense<0.000000e+00> : vector<264xf32>
    %17 = vector.multi_reduction <add>, %16, %cst_9 [1] : vector<264x128xf32> to vector<264xf32>
    %18 = vector.shape_cast %17 : vector<264xf32> to vector<264x1xf32>
    %19 = arith.maximumf %6, %12 : vector<264x1xf32>
    %20 = arith.maximumf %19, %18 : vector<264x1xf32>
    %21 = arith.subf %6, %20 : vector<264x1xf32>
    %22 = math.exp %21 : vector<264x1xf32>
    %23 = arith.subf %12, %20 : vector<264x1xf32>
    %24 = math.exp %23 : vector<264x1xf32>
    %25 = arith.subf %18, %20 : vector<264x1xf32>
    %26 = math.exp %25 : vector<264x1xf32>
    %27 = arith.addf %22, %24 : vector<264x1xf32>
    %28 = arith.addf %27, %26 : vector<264x1xf32>
    %29 = tpu.reciprocal %28 : vector<264x1xf32> -> vector<264x1xf32>
    %c0_10 = arith.constant 0 : index
    %c0_11 = arith.constant 0 : index
    %c0_12 = arith.constant 0 : index
    %30 = vector.load %arg1[%c0_10, %c0_11, %c0_12] : memref<3x264x128xf32, #tpu.memory_space<vmem>>, vector<1x264x128xf32>
    %31 = vector.shape_cast %30 : vector<1x264x128xf32> to vector<264x128xf32>
    %32 = vector.broadcast %22 : vector<264x1xf32> to vector<264x128xf32>
    %33 = arith.mulf %31, %32 : vector<264x128xf32>
    %c1_13 = arith.constant 1 : index
    %c0_14 = arith.constant 0 : index
    %c0_15 = arith.constant 0 : index
    %34 = vector.load %arg1[%c1_13, %c0_14, %c0_15] : memref<3x264x128xf32, #tpu.memory_space<vmem>>, vector<1x264x128xf32>
    %35 = vector.shape_cast %34 : vector<1x264x128xf32> to vector<264x128xf32>
    %36 = vector.broadcast %24 : vector<264x1xf32> to vector<264x128xf32>
    %37 = arith.mulf %35, %36 : vector<264x128xf32>
    %38 = arith.addf %33, %37 : vector<264x128xf32>
    %c2_16 = arith.constant 2 : index
    %c0_17 = arith.constant 0 : index
    %c0_18 = arith.constant 0 : index
    %39 = vector.load %arg1[%c2_16, %c0_17, %c0_18] : memref<3x264x128xf32, #tpu.memory_space<vmem>>, vector<1x264x128xf32>
    %40 = vector.shape_cast %39 : vector<1x264x128xf32> to vector<264x128xf32>
    %41 = vector.broadcast %26 : vector<264x1xf32> to vector<264x128xf32>
    %42 = arith.mulf %40, %41 : vector<264x128xf32>
    %43 = arith.addf %38, %42 : vector<264x128xf32>
    %44 = vector.broadcast %29 : vector<264x1xf32> to vector<264x128xf32>
    %45 = arith.mulf %43, %44 : vector<264x128xf32>
    %c0_19 = arith.constant 0 : index
    %c0_20 = arith.constant 0 : index
    %46 = vector.load %arg3[%c0_19, %c0_20] : memref<264x128xf32, #tpu.memory_space<vmem>>, vector<264x128xf32>
    tpu.vector_store %arg3[%c0_19, %c0_20], %45 {strides = array<i32>} : memref<264x128xf32, #tpu.memory_space<vmem>>, vector<264x128xf32>,
    return
  }
  func.func @transform_0(%arg0: i32) -> (i32, i32, i32) {
    %c0_i32 = arith.constant 0 : i32
    %c0_i32_0 = arith.constant 0 : i32
    %c0_i32_1 = arith.constant 0 : i32
    return %c0_i32, %arg0, %c0_i32_0 : i32, i32, i32
  }
  func.func @transform_1(%arg0: i32) -> (i32, i32) {
    %c0_i32 = arith.constant 0 : i32
    %c0_i32_0 = arith.constant 0 : i32
    %c0_i32_1 = arith.constant 0 : i32
    return %c0_i32, %c0_i32_0 : i32, i32
  }
  func.func @transform_2(%arg0: i32) -> (i32, i32) {
    %c0_i32 = arith.constant 0 : i32
    %c0_i32_0 = arith.constant 0 : i32
    return %arg0, %c0_i32 : i32, i32
  }
}

</mosaic_0001>

<bundles_post_ra>
// kernel: tpu_custom_call.1
= control target key start
LH: loop header
LB: loop body
LE: loop exit
PB: predicated region body
PF: predicated region fallthrough
CT: control target
= control target key end

     0   :  { %7 = vsyncpa [#allocation3], 0  ;;  %s2935_s0 = inlined_call_operand.hbm [shape: f32[3,520,128], index: 0, kind: input, shape index: {}]   ;;  %s2936_s1 = inlined_call_operand.vmem [shape: f32[1,128], index: 1, kind: input, shape index: {}]   ;;  %s2937_s2 = inlined_call_operand.hbm [shape: f32[520,128], index: 2, kind: output, shape index: {}]  }
   0x1   :  { %9 = vsyncpa [#allocation3 + $0x1], 0 }
   0x2   :  { %10 = vsyncpa [#allocation4], 0 }
   0x3   :  { %12 = vsyncpa [#allocation4 + $0x1], 0  ;;  %s1958_s9 = smov 0   ;;  %s1960_s10 = smov 0  }
   0x4   :  { %s1962_s11 = smov 0   ;;  %s1964_s12 = smov 0  }
   0x5 LB: > { %s1979_s13 = sadd.s32 4294967295, %s1933_s12   ;;  %s1395_s14 = sadd.s32 4294967294, %s1933_s12   ;;  %s1933_s12 = sphi %s1964_s12, %s3150_s12   ;;  %s1929_s11 = sphi %s1962_s11, %s3149_s11   ;;  %s1925_s10 = sphi %s1960_s10, %s3148_s10   ;;  %s1921_s9 = sphi %s1958_s9, %s3147_s9  }
   0x6   : > { %s1983_s15 = sadd.s32 1, %s1933_s12   ;;  %s25_s16 = sadd.s32 1, %s1929_s11 }
   0x7   : > { %s22_s17 = ssub.s32 %s1933_s12, %s1983_s15  ;;  %p32_p0 = scmp.ne.s32.totalorder %s1929_s11, %s1925_s10 }
   0x8   : > { %p23_p1 = scmp.eq.s32.totalorder %s22_s17, 0  ;;  %p33_p2 = scmp.eq.s32.totalorder %s1933_s12, 0 }
   0x9   : > { %p38_p3 = scmp.ne.s32.totalorder %s1925_s10, %s1921_s9  ;;  %p39_p4 = scmp.eq.s32.totalorder %s1979_s13, 0 }
   0xa   : > { %s1995_s18 = scalar_select %p23_p1, %s1929_s11, %s25_s16  }
   0xb   : > { %p34_p5 = por %p33_p2, %p32_p0  ;;  %p1997_p6 = por %p39_p4, %p38_p3 }
   0xc   : > { %p83_p7 = scmp.eq.s32.totalorder %s1979_s13, 1  ;;  %p89_p8 = scmp.eq.s32.totalorder %s1395_s14, 1 }
   0xd   : > { %p1397_p11 = scmp.ge.s32.totalorder %s1933_s12, 2 }
   0xe   : > { %p2002_p9 = por %p83_p7, %p32_p0  ;;  %p2006_p10 = por %p89_p8, %p38_p3 }
   0xf   : > { %108 = sbr.rel (%p1397_p11) target bundleno = 48 (0x30), region = 20 }
  0x16   : > { %111 = sbr.rel (!%p34_p5) target bundleno = 48 (0x30), region = 24 }
  0x1d   : > { %s112_s22 = sand.u32 1, %s1929_s11   ;;  %s117_s23 = smul.u32 33, %s1933_s12 }
  0x1e   : > { %s1482_s24 = smul.u32 792, %s112_s22  ;;  %s113_s28 = scalar_lea.sflag [#allocation3], %s112_s22 }
  0x1f   : > { %s118_s25 = ssub.s32 65, %s117_s23 }
  0x20   : > { %p119_p12 = scmp.lt.s32.totalorder %s118_s25, 33  ;;  %s116_s29 = scalar_lea.vmem [#allocation2], %s1482_s24 }
  0x22   : > { %s3152_s25 = smov (!%p119_p12, %s118_s25), 33 }
  0x23   : > { %s121_s26 = smul.u32 384, %s3152_s25 }
  0x25   : > { %s123_s27 = ssub.s32 12672, %s121_s26 }
  0x26   : > { %124 = vsyncadd %s113_s28, %s123_s27  ;;  %p1398_p13 = scmp.ne.s32.totalorder %s121_s26, 0  ;;  %s1480_s30 = smul.u32 4224, %s1933_s12 }
  0x27   : > { %s134_s3 = sld [smem:[#allocation0]]   ;;  %s142_s4 = sshll.u32 %s116_s29, 4  ;;  %s143_s4 = int_to_ptr.vmem [resolvable:$true] %s142_s4 }
  0x28   : > { %s127_s7 = scalar_lea.hbm %s2935_s0, %s1480_s30  ;;  %s1935_s8 = smov 8320  }
  0x29   : > { %149 = sst [smem:[#allocation7]] %s1935_s8  ;;  %s1936_s14 = smov 4224  }
  0x2a   : > { %151 = sst [smem:[#allocation7 + $0x1]] %s1936_s14  ;;  %s1937_s17 = smov 128  }
  0x2b   : > { %153 = sst [smem:[#allocation7 + $0x2]] %s3152_s25  ;;  %s1938_s23 = smov 8  }
  0x2c   : > { %155 = sst [smem:[#allocation7 + $0x3]] %s1937_s17  ;;  %s1939_s24 = smov [#allocation6]  }
  0x2d   : > { %s1402_s16 = sshll.u32 %s134_s3, 26  ;;  %157 = sst [smem:[#allocation7 + $0x4]] %s1937_s17 }
  0x2e   : > { %s1403_s22 = sadd.s32 134217728, %s1402_s16  ;;  %159 = sst [smem:[#allocation7 + $0x5]] %s1938_s23 }
  0x2f   : > { %161 = dma.general (%p1398_p13), %s127_s7, %s121_s26, %s143_s4, %s113_s28, %s1939_s24, [#allocation7], %s1403_s22, 0  }
  0x30 PF: > { %p1405_p0 = scmp.ge.s32.totalorder %s1933_s12, 1  ;;  %p163_p1 = scmp.lt.s32.totalorder %s1933_s12, 3 }
  0x32   : > { %p164_p2 = pnand %p1405_p0, %p163_p1 }
  0x34   : > { %167 = sbr.rel (%p164_p2) target bundleno = 558 (0x22e), region = 28 }
  0x3b   : > { %s2023_s25 = sand.u32 1, %s1925_s10  }
  0x3c   : > { %s1483_s27 = smul.u32 792, %s2023_s25  ;;  %s170_s29 = scalar_lea.sflag [#allocation3], %s2023_s25 }
  0x3e   : > { %s2027_s30 = scalar_lea.vmem [#allocation2], %s1483_s27 }
  0x3f   : > { %1912 = dma.done.wait (%p1997_p6), %s170_s29, 12672  }
  0x40   : > { %1914 = vsyncadd (%p1997_p6), %s170_s29, 4294954624  ;;  %v2036_v0 = vld [vmem:[%s2936_s1] ss:$0 sm:$0xff]  ;;  %v2039_v1 = vld [vmem:[%s2027_s30 + $0x10] sm:$0xff]  ;;  %s1484_s19 = smul.u32 264, %s2023_s25  ;;  %s1303_s4 = scalar_lea.sflag [#allocation4], %s2023_s25 }
  0x41   : > { %3012 = vst [vmem:[#allocation10_spill] sm:$0xff] %v2039_v1  ;;  %v2042_v2 = vld [vmem:[%s2027_s30] sm:$0xff]  ;;  %v246_v3 = vmul.f32 %v2036_v0, %v2039_v1  ;;  %v2049_v5 = vld [vmem:[%s2027_s30 + $0x18] sm:$0xff]  ;;  %v2052_v6 = vld [vmem:[%s2027_s30 + $0x8] sm:$0xff]  ;;  %s1310_s5 = smul.u32 (%p2002_p9), 33, %s1979_s13 }
  0x42   : > { %3013 = vst [vmem:[#allocation11_spill] sm:$0xff] %v2042_v2  ;;  %v244_v4 = vmul.f32 %v2036_v0, %v2042_v2  ;;  %3014 = vst [vmem:[#allocation12_spill] sm:$0xff] %v2049_v5  ;;  %v247_v7 = vmul.f32 %v2036_v0, %v2049_v5  ;;  %v245_v8 = vmul.f32 %v2036_v0, %v2052_v6  ;;  %v2059_v9 = vld [vmem:[%s2027_s30 + $0x28] sm:$0xff]  ;;  %v209_v10 = vld [vmem:[%s2027_s30 + $0x20] sm:$0xff]  ;;  %s2578_s3 = scalar_lea.vmem [#allocation5], %s1484_s19 }
  0x43   : > { %3015 = vst [vmem:[#allocation13_spill] sm:$0xff] %v2052_v6  ;;  %281 = vadd.xlane.f32.xlu1 %v246_v3  ;;  %3016 = vst [vmem:[#allocation14_spill] sm:$0xff] %v2059_v9  ;;  %v249_v11 = vmul.f32 %v2036_v0, %v2059_v9  ;;  %v248_v12 = vmul.f32 %v2036_v0, %v209_v10  ;;  %v212_v13 = vld [vmem:[%s2027_s30 + $0x38] sm:$0xff]  ;;  %v211_v14 = vld [vmem:[%s2027_s30 + $0x30] sm:$0xff]  ;;  %s1311_s6 = ssub.s32 (%p2002_p9), 65, %s1310_s5 }
  0x44   : > { %277 = vadd.xlane.f32.xlu0 %v244_v4  ;;  %v251_v15 = vmul.f32 %v2036_v0, %v212_v13  ;;  %v250_v16 = vmul.f32 %v2036_v0, %v211_v14  ;;  %v214_v17 = vld [vmem:[%s2027_s30 + $0x48] sm:$0xff]  ;;  %v213_v18 = vld [vmem:[%s2027_s30 + $0x40] sm:$0xff]  ;;  %v216_v21 = vld [vmem:[%s2027_s30 + $0x58] sm:$0xff]  ;;  %p1312_p3 = scmp.lt.s32.totalorder (%p2002_p9), %s1311_s6, 33 }
  0x45   : > { %v253_v19 = vmul.f32 %v2036_v0, %v214_v17  ;;  %v252_v20 = vmul.f32 %v2036_v0, %v213_v18  ;;  %v215_v22 = vld [vmem:[%s2027_s30 + $0x50] sm:$0xff]  ;;  %v255_v23 = vmul.f32 %v2036_v0, %v216_v21  ;;  %v218_v25 = vld [vmem:[%s2027_s30 + $0x68] sm:$0xff]  ;;  %v217_v26 = vld [vmem:[%s2027_s30 + $0x60] sm:$0xff] }
  0x46   : > { %v254_v24 = vmul.f32 %v2036_v0, %v215_v22  ;;  %v257_v27 = vmul.f32 %v2036_v0, %v218_v25  ;;  %v256_v28 = vmul.f32 %v2036_v0, %v217_v26  ;;  %v220_v29 = vld [vmem:[%s2027_s30 + $0x78] sm:$0xff]  ;;  %v219_v30 = vld [vmem:[%s2027_s30 + $0x70] sm:$0xff]  ;;  %v222_v33 = vld [vmem:[%s2027_s30 + $0x88] sm:$0xff] }
  0x47   : > { %283 = vadd.xlane.f32.xlu1 %v247_v7  ;;  %v259_v31 = vmul.f32 %v2036_v0, %v220_v29  ;;  %v258_v32 = vmul.f32 %v2036_v0, %v219_v30  ;;  %v221_v34 = vld [vmem:[%s2027_s30 + $0x80] sm:$0xff]  ;;  %v261_v35 = vmul.f32 %v2036_v0, %v222_v33  ;;  %v224_v37 = vld [vmem:[%s2027_s30 + $0x98] sm:$0xff]  ;;  %v223_v38 = vld [vmem:[%s2027_s30 + $0x90] sm:$0xff] }
  0x48   : > { %279 = vadd.xlane.f32.xlu0 %v245_v8  ;;  %v260_v36 = vmul.f32 %v2036_v0, %v221_v34  ;;  %v263_v39 = vmul.f32 %v2036_v0, %v224_v37  ;;  %v262_v40 = vmul.f32 %v2036_v0, %v223_v38  ;;  %v226_v41 = vld [vmem:[%s2027_s30 + $0xa8] sm:$0xff]  ;;  %v225_v42 = vld [vmem:[%s2027_s30 + $0xa0] sm:$0xff]  ;;  %v228_v45 = vld [vmem:[%s2027_s30 + $0xb8] sm:$0xff] }
  0x49   : > { %v265_v43 = vmul.f32 %v2036_v0, %v226_v41  ;;  %v264_v44 = vmul.f32 %v2036_v0, %v225_v42  ;;  %v227_v46 = vld [vmem:[%s2027_s30 + $0xb0] sm:$0xff]  ;;  %v267_v47 = vmul.f32 %v2036_v0, %v228_v45  ;;  %v230_v49 = vld [vmem:[%s2027_s30 + $0xc8] sm:$0xff]  ;;  %v229_v50 = vld [vmem:[%s2027_s30 + $0xc0] sm:$0xff] }
  0x4a   : > { %v266_v48 = vmul.f32 %v2036_v0, %v227_v46  ;;  %v269_v51 = vmul.f32 %v2036_v0, %v230_v49  ;;  %v268_v52 = vmul.f32 %v2036_v0, %v229_v50  ;;  %v232_v53 = vld [vmem:[%s2027_s30 + $0xd8] sm:$0xff]  ;;  %v231_v54 = vld [vmem:[%s2027_s30 + $0xd0] sm:$0xff]  ;;  %v234_v57 = vld [vmem:[%s2027_s30 + $0xe8] sm:$0xff] }
  0x4b   : > { %287 = vadd.xlane.f32.xlu1 %v249_v11  ;;  %v271_v55 = vmul.f32 %v2036_v0, %v232_v53  ;;  %v270_v56 = vmul.f32 %v2036_v0, %v231_v54  ;;  %v233_v58 = vld [vmem:[%s2027_s30 + $0xe0] sm:$0xff]  ;;  %v273_v59 = vmul.f32 %v2036_v0, %v234_v57  ;;  %v236_v61 = vld [vmem:[%s2027_s30 + $0xf8] sm:$0xff]  ;;  %v235_v62 = vld [vmem:[%s2027_s30 + $0xf0] sm:$0xff] }
  0x4c   : > { %285 = vadd.xlane.f32.xlu0 %v248_v12  ;;  %v272_v60 = vmul.f32 %v2036_v0, %v233_v58  ;;  %v275_v63 = vmul.f32 %v2036_v0, %v236_v61  ;;  %v274_v3 = vmul.f32 %v2036_v0, %v235_v62  ;;  %v2118_v4 = vld [vmem:[%s2027_s30 + $0x108] sm:$0xff]  ;;  %v237_v7 = vld [vmem:[%s2027_s30 + $0x100] sm:$0xff]  ;;  %v2125_v11 = vld [vmem:[%s2027_s30 + $0x118] sm:$0xff] }
  0x4d   : > { %3017 = vst [vmem:[#allocation15_spill] sm:$0xff] %v2118_v4  ;;  %v377_v8 = vmul.f32 %v2118_v4, %v2036_v0  ;;  %v276_v10 = vmul.f32 %v2036_v0, %v237_v7  ;;  %3018 = vst [vmem:[#allocation16_spill] sm:$0xff] %v2125_v11  ;;  %v2128_v12 = vld [vmem:[%s2027_s30 + $0x110] sm:$0xff]  ;;  %v379_v13 = vmul.f32 %v2125_v11, %v2036_v0 }
  0x4e   : > { %3019 = vst [vmem:[#allocation17_spill] sm:$0xff] %v2128_v12  ;;  %v378_v14 = vmul.f32 %v2128_v12, %v2036_v0 }
  0x4f   : > { %291 = vadd.xlane.f32.xlu1 %v251_v15  ;;  %v2135_v15 = vld [vmem:[%s2027_s30 + $0x128] sm:$0xff] }
  0x50   : > { %289 = vadd.xlane.f32.xlu0 %v250_v16  ;;  %3020 = vst [vmem:[#allocation18_spill] sm:$0xff] %v2135_v15  ;;  %v2138_v16 = vld [vmem:[%s2027_s30 + $0x120] sm:$0xff]  ;;  %v381_v17 = vmul.f32 %v2135_v15, %v2036_v0 }
  0x51   : > { %3021 = vst [vmem:[#allocation19_spill] sm:$0xff] %v2138_v16  ;;  %v380_v18 = vmul.f32 %v2138_v16, %v2036_v0 }
  0x53   : > { %295 = vadd.xlane.f32.xlu1 %v253_v19  ;;  %v2145_v19 = vld [vmem:[%s2027_s30 + $0x138] sm:$0xff] }
  0x54   : > { %293 = vadd.xlane.f32.xlu0 %v252_v20  ;;  %3022 = vst [vmem:[#allocation20_spill] sm:$0xff] %v2145_v19  ;;  %v2148_v20 = vld [vmem:[%s2027_s30 + $0x130] sm:$0xff]  ;;  %v383_v21 = vmul.f32 %v2145_v19, %v2036_v0 }
  0x55   : > { %3023 = vst [vmem:[#allocation21_spill] sm:$0xff] %v2148_v20  ;;  %v382_v22 = vmul.f32 %v2148_v20, %v2036_v0 }
  0x57   : > { %299 = vadd.xlane.f32.xlu1 %v255_v23  ;;  %v1415_v23 = vld [vmem:[%s2027_s30 + $0x148] sm:$0xff] }
  0x58   : > { %297 = vadd.xlane.f32.xlu0 %v254_v24  ;;  %v2156_v24 = vld [vmem:[%s2027_s30 + $0x140] sm:$0xff]  ;;  %v385_v25 = vmul.f32 %v1415_v23, %v2036_v0 }
  0x59   : > { %3024 = vst [vmem:[#allocation22_spill] sm:$0xff] %v2156_v24  ;;  %v384_v26 = vmul.f32 %v2156_v24, %v2036_v0 }
  0x5b   : > { %303 = vadd.xlane.f32.xlu1 %v257_v27  ;;  %v1417_v27 = vld [vmem:[%s2027_s30 + $0x158] sm:$0xff] }
  0x5c   : > { %301 = vadd.xlane.f32.xlu0 %v256_v28  ;;  %v2163_v28 = vld [vmem:[%s2027_s30 + $0x150] sm:$0xff]  ;;  %v387_v29 = vmul.f32 %v1417_v27, %v2036_v0 }
  0x5d   : > { %3025 = vst [vmem:[#allocation23_spill] sm:$0xff] %v2163_v28  ;;  %v386_v30 = vmul.f32 %v2163_v28, %v2036_v0 }
  0x5f   : > { %307 = vadd.xlane.f32.xlu1 %v259_v31  ;;  %v1419_v31 = vld [vmem:[%s2027_s30 + $0x168] sm:$0xff] }
  0x60   : > { %305 = vadd.xlane.f32.xlu0 %v258_v32  ;;  %v1418_v32 = vld [vmem:[%s2027_s30 + $0x160] sm:$0xff]  ;;  %v389_v33 = vmul.f32 %v1419_v31, %v2036_v0 }
  0x61   : > { %v388_v34 = vmul.f32 %v1418_v32, %v2036_v0  ;;  %v2226_v31 = vld [vmem:[%s2027_s30 + $0x220] sm:$0xff] }
  0x62   : > { %3029 = vst [vmem:[#allocation27_spill] sm:$0xff] %v2226_v31 }
  0x63   : > { %311 = vadd.xlane.f32.xlu1 %v261_v35  ;;  %v1421_v35 = vld [vmem:[%s2027_s30 + $0x178] sm:$0xff] }
  0x64   : > { %309 = vadd.xlane.f32.xlu0 %v260_v36  ;;  %v1420_v36 = vld [vmem:[%s2027_s30 + $0x170] sm:$0xff]  ;;  %v391_v37 = vmul.f32 %v1421_v35, %v2036_v0 }
  0x65   : > { %v390_v38 = vmul.f32 %v1420_v36, %v2036_v0  ;;  %v2236_v35 = vld [vmem:[%s2027_s30 + $0x230] sm:$0xff] }
  0x66   : > { %3031 = vst [vmem:[#allocation29_spill] sm:$0xff] %v2236_v35 }
  0x67   : > { %315 = vadd.xlane.f32.xlu1 %v263_v39  ;;  %v1423_v39 = vld [vmem:[%s2027_s30 + $0x188] sm:$0xff] }
  0x68   : > { %313 = vadd.xlane.f32.xlu0 %v262_v40  ;;  %v1422_v40 = vld [vmem:[%s2027_s30 + $0x180] sm:$0xff]  ;;  %v393_v41 = vmul.f32 %v1423_v39, %v2036_v0 }
  0x69   : > { %v392_v42 = vmul.f32 %v1422_v40, %v2036_v0  ;;  %v2246_v39 = vld [vmem:[%s2027_s30 + $0x240] sm:$0xff] }
  0x6a   : > { %3033 = vst [vmem:[#allocation31_spill] sm:$0xff] %v2246_v39 }
  0x6b   : > { %319 = vadd.xlane.f32.xlu1 %v265_v43  ;;  %v1425_v43 = vld [vmem:[%s2027_s30 + $0x198] sm:$0xff] }
  0x6c   : > { %317 = vadd.xlane.f32.xlu0 %v264_v44  ;;  %v1424_v44 = vld [vmem:[%s2027_s30 + $0x190] sm:$0xff]  ;;  %v395_v45 = vmul.f32 %v1425_v43, %v2036_v0 }
  0x6d   : > { %v394_v46 = vmul.f32 %v1424_v44, %v2036_v0  ;;  %v2257_v44 = vld [vmem:[%s2027_s30 + $0x258] sm:$0xff] }
  0x6e   : > { %3034 = vst [vmem:[#allocation32_spill] sm:$0xff] %v2257_v44 }
  0x6f   : > { %323 = vadd.xlane.f32.xlu1 %v267_v47  ;;  %v1427_v47 = vld [vmem:[%s2027_s30 + $0x1a8] sm:$0xff] }
  0x70   : > { %321 = vadd.xlane.f32.xlu0 %v266_v48  ;;  %v1426_v48 = vld [vmem:[%s2027_s30 + $0x1a0] sm:$0xff]  ;;  %v397_v49 = vmul.f32 %v1427_v47, %v2036_v0 }
  0x71   : > { %v396_v50 = vmul.f32 %v1426_v48, %v2036_v0 }
  0x73   : > { %327 = vadd.xlane.f32.xlu1 %v269_v51  ;;  %v1429_v51 = vld [vmem:[%s2027_s30 + $0x1b8] sm:$0xff] }
  0x74   : > { %325 = vadd.xlane.f32.xlu0 %v268_v52  ;;  %v1428_v52 = vld [vmem:[%s2027_s30 + $0x1b0] sm:$0xff]  ;;  %v399_v53 = vmul.f32 %v1429_v51, %v2036_v0  ;;  %v2274_v51 = vld [vmem:[%s2027_s30 + $0x260] sm:$0xff] }
  0x75   : > { %v398_v54 = vmul.f32 %v1428_v52, %v2036_v0  ;;  %3037 = vst [vmem:[#allocation35_spill] sm:$0xff] %v2274_v51 }
  0x77   : > { %331 = vadd.xlane.f32.xlu1 %v271_v55  ;;  %v1431_v55 = vld [vmem:[%s2027_s30 + $0x1c8] sm:$0xff] }
  0x78   : > { %329 = vadd.xlane.f32.xlu0 %v270_v56  ;;  %v1430_v56 = vld [vmem:[%s2027_s30 + $0x1c0] sm:$0xff]  ;;  %v401_v57 = vmul.f32 %v1431_v55, %v2036_v0 }
  0x79   : > { %v400_v58 = vmul.f32 %v1430_v56, %v2036_v0  ;;  %v2285_v56 = vld [vmem:[%s2027_s30 + $0x278] sm:$0xff] }
  0x7a   : > { %3038 = vst [vmem:[#allocation36_spill] sm:$0xff] %v2285_v56 }
  0x7b   : > { %335 = vadd.xlane.f32.xlu1 %v273_v59  ;;  %v1433_v59 = vld [vmem:[%s2027_s30 + $0x1d8] sm:$0xff] }
  0x7c   : > { %333 = vadd.xlane.f32.xlu0 %v272_v60  ;;  %v1432_v60 = vld [vmem:[%s2027_s30 + $0x1d0] sm:$0xff]  ;;  %v403_v61 = vmul.f32 %v1433_v59, %v2036_v0 }
  0x7d   : > { %v402_v62 = vmul.f32 %v1432_v60, %v2036_v0 }
  0x7f   : > { %339 = vadd.xlane.f32.xlu1 %v275_v63  ;;  %v1435_v63 = vld [vmem:[%s2027_s30 + $0x1e8] sm:$0xff] }
  0x80   : > { %337 = vadd.xlane.f32.xlu0 %v274_v3  ;;  %v1434_v3 = vld [vmem:[%s2027_s30 + $0x1e0] sm:$0xff]  ;;  %v405_v7 = vmul.f32 %v1435_v63, %v2036_v0 }
  0x81   : > { %v1454_v63 = vld [vmem:[%s2027_s30 + $0x280] sm:$0xff] }
  0x83   : > { %410 = vadd.xlane.f32.xlu1 %v377_v8  ;;  %v404_v8 = vmul.f32 %v1434_v3, %v2036_v0 }
  0x84   : > { %341 = vadd.xlane.f32.xlu0 %v276_v10  ;;  %v1437_v10 = vld [vmem:[%s2027_s30 + $0x1f8] sm:$0xff] }
  0x87   : > { %414 = vadd.xlane.f32.xlu1 %v379_v13  ;;  %v1436_v13 = vld [vmem:[%s2027_s30 + $0x1f0] sm:$0xff] }
  0x88   : > { %412 = vadd.xlane.f32.xlu0 %v378_v14  ;;  %v407_v14 = vmul.f32 %v1437_v10, %v2036_v0 }
  0x8b   : > { %418 = vadd.xlane.f32.xlu1 %v381_v17  ;;  %v406_v17 = vmul.f32 %v1436_v13, %v2036_v0  ;;  %v1457_v13 = vld [vmem:[%s2027_s30 + $0x298] sm:$0xff] }
  0x8c   : > { %416 = vadd.xlane.f32.xlu0 %v380_v18  ;;  %v1439_v18 = vld [vmem:[%s2027_s30 + $0x208] sm:$0xff] }
  0x8f   : > { %422 = vadd.xlane.f32.xlu1 %v383_v21  ;;  %v1438_v21 = vld [vmem:[%s2027_s30 + $0x200] sm:$0xff] }
  0x90   : > { %420 = vadd.xlane.f32.xlu0 %v382_v22  ;;  %v409_v22 = vmul.f32 %v1439_v18, %v2036_v0  ;;  %v408_v23 = vmul.f32 %v1438_v21, %v2036_v0 }
  0x93   : > { %426 = vadd.xlane.f32.xlu1 %v385_v25  ;;  %v2213_v25 = vld [vmem:[%s2027_s30 + $0x218] sm:$0xff] }
  0x94   : > { %424 = vadd.xlane.f32.xlu0 %v384_v26  ;;  %3026 = vst [vmem:[#allocation24_spill] sm:$0xff] %v2213_v25  ;;  %v2216_v26 = vld [vmem:[%s2027_s30 + $0x210] sm:$0xff]  ;;  %v511_v27 = vmul.f32 %v2213_v25, %v2036_v0 }
  0x95   : > { %3027 = vst [vmem:[#allocation25_spill] sm:$0xff] %v2216_v26 }
  0x97   : > { %430 = vadd.xlane.f32.xlu1 %v387_v29  ;;  %v510_v29 = vmul.f32 %v2216_v26, %v2036_v0 }
  0x98   : > { %428 = vadd.xlane.f32.xlu0 %v386_v30  ;;  %v2223_v30 = vld [vmem:[%s2027_s30 + $0x228] sm:$0xff] }
  0x99   : > { %3028 = vst [vmem:[#allocation26_spill] sm:$0xff] %v2223_v30  ;;  %v513_v32 = vmul.f32 %v2223_v30, %v2036_v0 }
  0x9b   : > { %434 = vadd.xlane.f32.xlu1 %v389_v33  ;;  %v512_v33 = vmul.f32 %v2226_v31, %v2036_v0 }
  0x9c   : > { %432 = vadd.xlane.f32.xlu0 %v388_v34  ;;  %v2233_v34 = vld [vmem:[%s2027_s30 + $0x238] sm:$0xff] }
  0x9d   : > { %3030 = vst [vmem:[#allocation28_spill] sm:$0xff] %v2233_v34  ;;  %v515_v36 = vmul.f32 %v2233_v34, %v2036_v0 }
  0x9f   : > { %438 = vadd.xlane.f32.xlu1 %v391_v37  ;;  %v514_v37 = vmul.f32 %v2236_v35, %v2036_v0 }
  0xa0   : > { %436 = vadd.xlane.f32.xlu0 %v390_v38  ;;  %v2243_v38 = vld [vmem:[%s2027_s30 + $0x248] sm:$0xff] }
  0xa1   : > { %3032 = vst [vmem:[#allocation30_spill] sm:$0xff] %v2243_v38  ;;  %v517_v40 = vmul.f32 %v2243_v38, %v2036_v0 }
  0xa3   : > { %442 = vadd.xlane.f32.xlu1 %v393_v41  ;;  %v516_v41 = vmul.f32 %v2246_v39, %v2036_v0 }
  0xa4   : > { %440 = vadd.xlane.f32.xlu0 %v392_v42 }
  0xa7   : > { %446 = vadd.xlane.f32.xlu1 %v395_v45  ;;  %v2260_v45 = vld [vmem:[%s2027_s30 + $0x250] sm:$0xff] }
  0xa8   : > { %444 = vadd.xlane.f32.xlu0 %v394_v46  ;;  %3035 = vst [vmem:[#allocation33_spill] sm:$0xff] %v2260_v45  ;;  %v519_v46 = vmul.f32 %v2257_v44, %v2036_v0  ;;  %v518_v47 = vmul.f32 %v2260_v45, %v2036_v0 }
  0xab   : > { %450 = vadd.xlane.f32.xlu1 %v397_v49 }
  0xac   : > { %448 = vadd.xlane.f32.xlu0 %v396_v50  ;;  %v2271_v50 = vld [vmem:[%s2027_s30 + $0x268] sm:$0xff] }
  0xad   : > { %3036 = vst [vmem:[#allocation34_spill] sm:$0xff] %v2271_v50  ;;  %v521_v52 = vmul.f32 %v2271_v50, %v2036_v0 }
  0xaf   : > { %454 = vadd.xlane.f32.xlu1 %v399_v53  ;;  %v520_v53 = vmul.f32 %v2274_v51, %v2036_v0 }
  0xb0   : > { %452 = vadd.xlane.f32.xlu0 %v398_v54 }
  0xb3   : > { %458 = vadd.xlane.f32.xlu1 %v401_v57  ;;  %v1452_v57 = vld [vmem:[%s2027_s30 + $0x270] sm:$0xff] }
  0xb4   : > { %456 = vadd.xlane.f32.xlu0 %v400_v58  ;;  %v523_v58 = vmul.f32 %v2285_v56, %v2036_v0  ;;  %v522_v59 = vmul.f32 %v1452_v57, %v2036_v0  ;;  %v1462_v57 = vld [vmem:[%s2027_s30 + $0x2c0] sm:$0xff] }
  0xb7   : > { %462 = vadd.xlane.f32.xlu1 %v403_v61 }
  0xb8   : > { %460 = vadd.xlane.f32.xlu0 %v402_v62  ;;  %v1455_v62 = vld [vmem:[%s2027_s30 + $0x288] sm:$0xff] }
  0xb9   : > { %v525_v3 = vmul.f32 %v1455_v62, %v2036_v0 }
  0xbb   : > { %466 = vadd.xlane.f32.xlu1 %v405_v7  ;;  %v524_v7 = vmul.f32 %v1454_v63, %v2036_v0 }
  0xbc   : > { %464 = vadd.xlane.f32.xlu0 %v404_v8 }
  0xbf   : > { %470 = vadd.xlane.f32.xlu1 %v407_v14  ;;  %v1456_v14 = vld [vmem:[%s2027_s30 + $0x290] sm:$0xff] }
  0xc0   : > { %468 = vadd.xlane.f32.xlu0 %v406_v17  ;;  %v527_v17 = vmul.f32 %v1457_v13, %v2036_v0  ;;  %v526_v18 = vmul.f32 %v1456_v14, %v2036_v0 }
  0xc3   : > { %474 = vadd.xlane.f32.xlu1 %v409_v22 }
  0xc4   : > { %472 = vadd.xlane.f32.xlu0 %v408_v23  ;;  %v1459_v23 = vld [vmem:[%s2027_s30 + $0x2a8] sm:$0xff] }
  0xc7   : > { %545 = vadd.xlane.f32.xlu1 %v511_v27  ;;  %v1458_v27 = vld [vmem:[%s2027_s30 + $0x2a0] sm:$0xff] }
  0xc8   : > { %543 = vadd.xlane.f32.xlu0 %v510_v29  ;;  %v529_v29 = vmul.f32 %v1459_v23, %v2036_v0  ;;  %v1467_v23 = vld [vmem:[%s2027_s30 + $0x2e8] sm:$0xff] }
  0xcb   : > { %549 = vadd.xlane.f32.xlu1 %v513_v32  ;;  %v528_v32 = vmul.f32 %v1458_v27, %v2036_v0  ;;  %v1466_v27 = vld [vmem:[%s2027_s30 + $0x2e0] sm:$0xff] }
  0xcc   : > { %547 = vadd.xlane.f32.xlu0 %v512_v33 }
  0xcf   : > { %553 = vadd.xlane.f32.xlu1 %v515_v36 }
  0xd0   : > { %551 = vadd.xlane.f32.xlu0 %v514_v37  ;;  %v2252_v42 = vpop.xlane.xlu1 %281  ;;  %v1461_v37 = vld [vmem:[%s2027_s30 + $0x2b8] sm:$0xff] }
  0xd1   : > { %v2254_v43 = vpop.xlane.xlu0 %277 }
  0xd3   : > { %557 = vadd.xlane.f32.xlu1 %v517_v40  ;;  %v1460_v40 = vld [vmem:[%s2027_s30 + $0x2b0] sm:$0xff] }
  0xd4   : > { %555 = vadd.xlane.f32.xlu0 %v516_v41  ;;  %v2266_v48 = vpop.xlane.xlu1 %283  ;;  %v531_v41 = vmul.f32 %v1461_v37, %v2036_v0 }
  0xd5   : > { %v2268_v49 = vpop.xlane.xlu0 %279 }
  0xd7   : > { %561 = vadd.xlane.f32.xlu1 %v519_v46  ;;  %v530_v46 = vmul.f32 %v1460_v40, %v2036_v0 }
  0xd8   : > { %559 = vadd.xlane.f32.xlu0 %v518_v47  ;;  %v2280_v54 = vpop.xlane.xlu1 %287 }
  0xd9   : > { %v2282_v55 = vpop.xlane.xlu0 %285 }
  0xdb   : > { %565 = vadd.xlane.f32.xlu1 %v521_v52 }
  0xdc   : > { %563 = vadd.xlane.f32.xlu0 %v520_v53  ;;  %v2291_v60 = vpop.xlane.xlu1 %291  ;;  %v1463_v53 = vld [vmem:[%s2027_s30 + $0x2c8] sm:$0xff] }
  0xdd   : > { %v2293_v61 = vpop.xlane.xlu0 %289 }
  0xde   : > { %3039 = vst [vmem:[#allocation37_spill] sm:$0xff] %v2293_v61 }
  0xdf   : > { %569 = vadd.xlane.f32.xlu1 %v523_v58  ;;  %v533_v58 = vmul.f32 %v1463_v53, %v2036_v0 }
  0xe0   : > { %567 = vadd.xlane.f32.xlu0 %v522_v59  ;;  %v2299_v8 = vpop.xlane.xlu1 %295  ;;  %v532_v59 = vmul.f32 %v1462_v57, %v2036_v0 }
  0xe1   : > { %v2301_v10 = vpop.xlane.xlu0 %293 }
  0xe2   : > { %3040 = vst [vmem:[#allocation38_spill] sm:$0xff] %v2301_v10 }
  0xe3   : > { %573 = vadd.xlane.f32.xlu1 %v525_v3  ;;  %v1465_v3 = vld [vmem:[%s2027_s30 + $0x2d8] sm:$0xff] }
  0xe4   : > { %571 = vadd.xlane.f32.xlu0 %v524_v7  ;;  %v2307_v21 = vpop.xlane.xlu1 %299  ;;  %v1464_v7 = vld [vmem:[%s2027_s30 + $0x2d0] sm:$0xff]  ;;  %v535_v13 = vmul.f32 %v1465_v3, %v2036_v0  ;;  %v1471_v3 = vld [vmem:[%s2027_s30 + $0x308] sm:$0xff] }
  0xe5   : > { %v2309_v22 = vpop.xlane.xlu0 %297  ;;  %v534_v14 = vmul.f32 %v1464_v7, %v2036_v0  ;;  %v1470_v7 = vld [vmem:[%s2027_s30 + $0x300] sm:$0xff] }
  0xe7   : > { %577 = vadd.xlane.f32.xlu1 %v527_v17 }
  0xe8   : > { %575 = vadd.xlane.f32.xlu0 %v526_v18  ;;  %v2315_v33 = vpop.xlane.xlu1 %303 }
  0xe9   : > { %v2317_v36 = vpop.xlane.xlu0 %301 }
  0xeb   : > { %581 = vadd.xlane.f32.xlu1 %v529_v29  ;;  %v537_v29 = vmul.f32 %v1467_v23, %v2036_v0 }
  0xec   : > { %579 = vadd.xlane.f32.xlu0 %v528_v32  ;;  %v2323_v47 = vpop.xlane.xlu1 %307  ;;  %v536_v32 = vmul.f32 %v1466_v27, %v2036_v0 }
  0xed   : > { %v2325_v52 = vpop.xlane.xlu0 %305 }
  0xef   : > { %585 = vadd.xlane.f32.xlu1 %v531_v41  ;;  %v1469_v41 = vld [vmem:[%s2027_s30 + $0x2f8] sm:$0xff] }
  0xf0   : > { %583 = vadd.xlane.f32.xlu0 %v530_v46  ;;  %v2331_v62 = vpop.xlane.xlu1 %311  ;;  %v1468_v46 = vld [vmem:[%s2027_s30 + $0x2f0] sm:$0xff]  ;;  %v539_v53 = vmul.f32 %v1469_v41, %v2036_v0 }
  0xf1   : > { %v2333_v63 = vpop.xlane.xlu0 %309  ;;  %v538_v57 = vmul.f32 %v1468_v46, %v2036_v0 }
  0xf2   : > { %3041 = vst [vmem:[#allocation39_spill] sm:$0xff] %v2333_v63 }
  0xf3   : > { %589 = vadd.xlane.f32.xlu1 %v533_v58 }
  0xf4   : > { %587 = vadd.xlane.f32.xlu0 %v532_v59  ;;  %v2339_v17 = vpop.xlane.xlu1 %315 }
  0xf5   : > { %v2341_v18 = vpop.xlane.xlu0 %313 }
  0xf6   : > { %3042 = vst [vmem:[#allocation40_spill] sm:$0xff] %v2341_v18 }
  0xf7   : > { %593 = vadd.xlane.f32.xlu1 %v535_v13  ;;  %v541_v13 = vmul.f32 %v1471_v3, %v2036_v0 }
  0xf8   : > { %591 = vadd.xlane.f32.xlu0 %v534_v14  ;;  %v2347_v37 = vpop.xlane.xlu1 %319  ;;  %v540_v14 = vmul.f32 %v1470_v7, %v2036_v0 }
  0xf9   : > { %v2349_v40 = vpop.xlane.xlu0 %317 }
  0xfb   : > { %597 = vadd.xlane.f32.xlu1 %v537_v29  ;;  %v1472_v29 = vld [vmem:[%s2027_s30 + $0x310] sm:$0xff] }
  0xfc   : > { %595 = vadd.xlane.f32.xlu0 %v536_v32  ;;  %v2355_v58 = vpop.xlane.xlu1 %323  ;;  %v542_v32 = vmul.f32 %v1472_v29, %v2036_v0 }
  0xfd   : > { %v2357_v59 = vpop.xlane.xlu0 %321 }
  0xff   : > { %601 = vadd.xlane.f32.xlu1 %v539_v53 }
 0x100   : > { %599 = vadd.xlane.f32.xlu0 %v538_v57  ;;  %v2363_v23 = vpop.xlane.xlu1 %327 }
 0x101   : > { %3043 = vst [vmem:[#allocation41_spill] sm:$0xff] %v2363_v23  ;;  %v2365_v27 = vpop.xlane.xlu0 %325 }
 0x102   : > { %3044 = vst [vmem:[#allocation42_spill] sm:$0xff] %v2365_v27 }
 0x103   : > { %605 = vadd.xlane.f32.xlu1 %v541_v13 }
 0x104   : > { %603 = vadd.xlane.f32.xlu0 %v540_v14  ;;  %v2369_v41 = vpop.xlane.xlu1 %331 }
 0x105   : > { %3045 = vst [vmem:[#allocation43_spill] sm:$0xff] %v2369_v41  ;;  %v2371_v46 = vpop.xlane.xlu0 %329 }
 0x106   : > { %3046 = vst [vmem:[#allocation44_spill] sm:$0xff] %v2371_v46 }
 0x108   : > { %607 = vadd.xlane.f32.xlu0 %v542_v32  ;;  %v2373_v53 = vpop.xlane.xlu1 %335 }
 0x109   : > { %3047 = vst [vmem:[#allocation45_spill] sm:$0xff] %v2373_v53  ;;  %v2375_v57 = vpop.xlane.xlu0 %333 }
 0x10a   : > { %3048 = vst [vmem:[#allocation46_spill] sm:$0xff] %v2375_v57 }
 0x10c   : > { %v2377_v3 = vpop.xlane.xlu1 %339 }
 0x10d   : > { %3049 = vst [vmem:[#allocation47_spill] sm:$0xff] %v2377_v3  ;;  %v2379_v7 = vpop.xlane.xlu0 %337 }
 0x10e   : > { %3050 = vst [vmem:[#allocation48_spill] sm:$0xff] %v2379_v7 }
 0x110   : > { %v2381_v56 = vpop.xlane.xlu1 %410 }
 0x111   : > { %v2383_v51 = vpop.xlane.xlu0 %341  ;;  %v609_v2 = vmax.f32 %v2254_v43, %v2381_v56 }
 0x112   : > { %3051 = vst [vmem:[#allocation49_spill] sm:$0xff] %v2383_v51 }
 0x114   : > { %v2385_v13 = vpop.xlane.xlu1 %414 }
 0x115   : > { %v2387_v0 = vpop.xlane.xlu0 %412  ;;  %v611_v25 = vmax.f32 %v2252_v42, %v2385_v13 }
 0x116   : > { %v610_v12 = vmax.f32 %v2268_v49, %v2387_v0 }
 0x118   : > { %v2389_v14 = vpop.xlane.xlu1 %418 }
 0x119   : > { %v2391_v29 = vpop.xlane.xlu0 %416 }
 0x11c   : > { %v2393_v32 = vpop.xlane.xlu1 %422 }
 0x11d   : > { %3052 = vst [vmem:[#allocation50_spill] sm:$0xff] %v2393_v32  ;;  %v2395_v53 = vpop.xlane.xlu0 %420 }
 0x120   : > { %v2397_v41 = vpop.xlane.xlu1 %426 }
 0x121   : > { %3053 = vst [vmem:[#allocation51_spill] sm:$0xff] %v2397_v41  ;;  %v2399_v3 = vpop.xlane.xlu0 %424 }
 0x124   : > { %v2401_v7 = vpop.xlane.xlu1 %430 }
 0x125   : > { %v2403_v57 = vpop.xlane.xlu0 %428 }
 0x128   : > { %v2405_v51 = vpop.xlane.xlu1 %434 }
 0x129   : > { %3054 = vst [vmem:[#allocation52_spill] sm:$0xff] %v2405_v51  ;;  %v2407_v50 = vpop.xlane.xlu0 %432 }
 0x12c   : > { %v2409_v45 = vpop.xlane.xlu1 %438 }
 0x12d   : > { %3055 = vst [vmem:[#allocation53_spill] sm:$0xff] %v2409_v45  ;;  %v2411_v44 = vpop.xlane.xlu0 %436 }
 0x130   : > { %v2413_v28 = vpop.xlane.xlu1 %442 }
 0x131   : > { %3056 = vst [vmem:[#allocation54_spill] sm:$0xff] %v2413_v28  ;;  %v2415_v39 = vpop.xlane.xlu0 %440 }
 0x134   : > { %v2417_v19 = vpop.xlane.xlu1 %446 }
 0x135   : > { %3057 = vst [vmem:[#allocation55_spill] sm:$0xff] %v2417_v19  ;;  %v2419_v38 = vpop.xlane.xlu0 %444 }
 0x138   : > { %v2421_v24 = vpop.xlane.xlu1 %450 }
 0x139   : > { %3058 = vst [vmem:[#allocation56_spill] sm:$0xff] %v2421_v24  ;;  %v2423_v35 = vpop.xlane.xlu0 %448 }
 0x13c   : > { %v2425_v15 = vpop.xlane.xlu1 %454 }
 0x13d   : > { %v2427_v34 = vpop.xlane.xlu0 %452 }
 0x140   : > { %v2429_v31 = vpop.xlane.xlu1 %458 }
 0x141   : > { %3059 = vst [vmem:[#allocation57_spill] sm:$0xff] %v2429_v31  ;;  %v2431_v20 = vpop.xlane.xlu0 %456  ;;  %v3083_v31 = vld [vmem:[#allocation25_spill] sm:$0xff] }
 0x144   : > { %v2433_v9 = vpop.xlane.xlu1 %462 }
 0x145   : > { %3060 = vst [vmem:[#allocation58_spill] sm:$0xff] %v2433_v9  ;;  %v2435_v11 = vpop.xlane.xlu0 %460  ;;  %v3081_v9 = vld [vmem:[#allocation11_spill] sm:$0xff] }
 0x146   : > { %3061 = vst [vmem:[#allocation59_spill] sm:$0xff] %v2435_v11 }
 0x148   : > { %v2437_v1 = vpop.xlane.xlu1 %466 }
 0x149   : > { %3062 = vst [vmem:[#allocation60_spill] sm:$0xff] %v2437_v1  ;;  %v2439_v30 = vpop.xlane.xlu0 %464 }
 0x14a   : > { %3063 = vst [vmem:[#allocation61_spill] sm:$0xff] %v2439_v30  ;;  %v613_v30 = vmax.f32 %v2282_v55, %v2389_v14 }
 0x14c   : > { %v2441_v16 = vpop.xlane.xlu1 %470 }
 0x14d   : > { %3064 = vst [vmem:[#allocation62_spill] sm:$0xff] %v2441_v16  ;;  %v2443_v5 = vpop.xlane.xlu0 %468  ;;  %v612_v16 = vmax.f32 %v2266_v48, %v2391_v29 }
 0x14e   : > { %3065 = vst [vmem:[#allocation63_spill] sm:$0xff] %v2443_v5 }
 0x150   : > { %v2445_v26 = vpop.xlane.xlu1 %474 }
 0x151   : > { %3066 = vst [vmem:[#allocation64_spill] sm:$0xff] %v2445_v26  ;;  %v2447_v4 = vpop.xlane.xlu0 %472 }
 0x152   : > { %3067 = vst [vmem:[#allocation65_spill] sm:$0xff] %v2447_v4  ;;  %v614_v4 = vmax.f32 %v2280_v54, %v2395_v53 }
 0x154   : > { %v546_v32 = vpop.xlane.xlu1 %545 }
 0x155   : > { %v544_v61 = vpop.xlane.xlu0 %543  ;;  %v643_v41 = vmax.f32 %v610_v12, %v546_v32 }
 0x156   : > { %v642_v10 = vmax.f32 %v609_v2, %v544_v61 }
 0x157   : > { %v676_v51 = vsub.f32 %v2268_v49, %v643_v41  ;;  %v775_v5 = vsub.f32 %v2387_v0, %v643_v41  ;;  %v874_v45 = vsub.f32 %v546_v32, %v643_v41 }
 0x158   : > { %v675_v12 = vsub.f32 %v2254_v43, %v642_v10  ;;  %v774_v23 = vsub.f32 %v2381_v56, %v642_v10  ;;  %v873_v1 = vsub.f32 %v544_v61, %v642_v10  ;;  %v550_v11 = vpop.xlane.xlu1 %549 }
 0x159   : > { %v548_v19 = vpop.xlane.xlu0 %547  ;;  %v710_v18 = vmul.f32 1.442695, %v676_v51  ;;  %v809_v26 = vmul.f32 1.442695, %v775_v5  ;;  %v908_v28 = vmul.f32 1.442695, %v874_v45  ;;  %v645_v49 = vmax.f32 %v612_v16, %v550_v11 }
 0x15a   : > { %v708_v63 = vmul.f32 1.442695, %v675_v12  ;;  %v807_v0 = vmul.f32 1.442695, %v774_v23  ;;  %v906_v41 = vmul.f32 1.442695, %v873_v1  ;;  %v644_v32 = vmax.f32 %v611_v25, %v548_v19 }
 0x15b   : > { %1531 = vpow2.f32 %v710_v18  ;;  %v678_v43 = vsub.f32 %v2266_v48, %v645_v49  ;;  %v777_v2 = vsub.f32 %v2391_v29, %v645_v49  ;;  %v876_v24 = vsub.f32 %v550_v11, %v645_v49  ;;  %v3079_v16 = vld [vmem:[#allocation51_spill] sm:$0xff] }
 0x15c   : > { %1533 = vpow2.f32 %v809_v26  ;;  %v677_v56 = vsub.f32 %v2252_v42, %v644_v32  ;;  %v776_v61 = vsub.f32 %v2385_v13, %v644_v32  ;;  %v875_v10 = vsub.f32 %v548_v19, %v644_v32  ;;  %v554_v51 = vpop.xlane.xlu1 %553 }
 0x15d   : > { %v552_v5 = vpop.xlane.xlu0 %551  ;;  %1535 = vpow2.f32 %v908_v28  ;;  %v714_v25 = vmul.f32 1.442695, %v678_v43  ;;  %v813_v26 = vmul.f32 1.442695, %v777_v2  ;;  %v912_v19 = vmul.f32 1.442695, %v876_v24 }
 0x15e   : > { %1537 = vpow2.f32 %v708_v63  ;;  %v647_v42 = vmax.f32 %v614_v4, %v554_v51  ;;  %v646_v48 = vmax.f32 %v613_v30, %v552_v5  ;;  %v712_v18 = vmul.f32 1.442695, %v677_v56  ;;  %v3077_v30 = vld [vmem:[#allocation24_spill] sm:$0xff] }
 0x15f   : > { %1539 = vpow2.f32 %v807_v0  ;;  %v811_v23 = vmul.f32 1.442695, %v776_v61  ;;  %v910_v13 = vmul.f32 1.442695, %v875_v10 }
 0x160   : > { %1541 = vpow2.f32 %v906_v41  ;;  %v2507_v29 = vpop.xlane.xlu1 %557  ;;  %v680_v12 = vsub.f32 %v2280_v54, %v647_v42  ;;  %v779_v49 = vsub.f32 %v2395_v53, %v647_v42  ;;  %v878_v32 = vsub.f32 %v554_v51, %v647_v42  ;;  %v3078_v41 = vld [vmem:[#allocation38_spill] sm:$0xff] }
 0x161   : > { %v2509_v28 = vpop.xlane.xlu0 %555  ;;  %1543 = vpow2.f32 %v714_v25  ;;  %v679_v63 = vsub.f32 %v2282_v55, %v646_v48  ;;  %v778_v4 = vsub.f32 %v2389_v14, %v646_v48  ;;  %v877_v24 = vsub.f32 %v552_v5, %v646_v48  ;;  %v3072_v48 = vld [vmem:[#allocation37_spill] sm:$0xff] }
 0x162   : > { %1545 = vpow2.f32 %v813_v26  ;;  %v718_v43 = vmul.f32 1.442695, %v680_v12  ;;  %v817_v56 = vmul.f32 1.442695, %v779_v49  ;;  %v916_v54 = vmul.f32 1.442695, %v878_v32 }
 0x163   : > { %1547 = vpow2.f32 %v912_v19  ;;  %v716_v61 = vmul.f32 1.442695, %v679_v63  ;;  %v815_v55 = vmul.f32 1.442695, %v778_v4  ;;  %v914_v51 = vmul.f32 1.442695, %v877_v24 }
 0x164   : > { %1549 = vpow2.f32 %v712_v18  ;;  %v2519_v53 = vpop.xlane.xlu1 %561  ;;  %v3070_v14 = vmax.f32 %v2291_v60, %v2399_v3  ;;  %v3071_v19 = vmov %v2052_v6  ;;  %v3073_v18 = vld [vmem:[#allocation50_spill] sm:$0xff]  ;;  %v3076_v24 = vld [vmem:[#allocation17_spill] sm:$0xff]  ;;  %v3080_v11 = vmax.f32 %v3078_v41, %v3079_v16 }
 0x165   : > { %v1532_v10 = vpop.eup %1531  ;;  %1551 = vpow2.f32 %v811_v23  ;;  %v2525_v25 = vpop.xlane.xlu0 %559  ;;  %v3074_v12 = vmax.f32 %v3072_v48, %v3073_v18  ;;  %v3075_v23 = vmax.f32 %v2299_v8, %v2403_v57 }
 0x166   : > { %v649_v5 = vmax.f32 %v3070_v14, %v2507_v29  ;;  %v1534_v26 = vpop.eup %1533  ;;  %v1072_v42 = vmul.f32 %v1532_v10, %v3071_v19  ;;  %1553 = vpow2.f32 %v910_v13  ;;  %v2548_v1 = vmax.f32 %v3080_v11, %v2525_v25 }
 0x167   : > { %v2532_v49 = vmax.f32 %v3074_v12, %v2509_v28  ;;  %v2538_v32 = vmax.f32 %v3075_v23, %v2519_v53  ;;  %v1536_v63 = vpop.eup %1535  ;;  %v973_v4 = vadd.f32 %v1534_v26, %v1532_v10  ;;  %v1105_v14 = vmul.f32 %v1534_v26, %v3076_v24  ;;  %v3082_v24 = vld [vmem:[#allocation15_spill] sm:$0xff] }
 0x168   : > { %1555 = vpow2.f32 %v718_v43  ;;  %v682_v19 = vsub.f32 %v2291_v60, %v649_v5  ;;  %v1538_v13 = vpop.eup %1537  ;;  %v1171_v45 = vmul.f32 %v1536_v63, %v3077_v30  ;;  %v781_v12 = vsub.f32 %v2399_v3, %v649_v5 }
 0x169   : > { %1557 = vpow2.f32 %v817_v56  ;;  %v1540_v23 = vpop.eup %1539  ;;  %v1006_v6 = vadd.f32 %v1536_v63, %v973_v4  ;;  %v1138_v10 = vadd.f32 %v1105_v14, %v1072_v42  ;;  %v1071_v26 = vmul.f32 %v1538_v13, %v3081_v9  ;;  %v3084_v63 = vld [vmem:[#allocation12_spill] sm:$0xff] }
 0x16a   : > { %1559 = vpow2.f32 %v916_v54  ;;  %v1542_v43 = vpop.eup %1541  ;;  %v972_v60 = vadd.f32 %v1540_v23, %v1538_v13  ;;  %v1104_v46 = vmul.f32 %v1540_v23, %v3082_v24  ;;  %v880_v30 = vsub.f32 %v2507_v29, %v649_v5  ;;  %v3085_v13 = vld [vmem:[#allocation19_spill] sm:$0xff] }
 0x16b   : > { %1561 = vpow2.f32 %v716_v61  ;;  %v1544_v3 = vpop.eup %1543  ;;  %v1204_v56 = vadd.f32 %v1171_v45, %v1138_v10  ;;  %v1170_v27 = vmul.f32 %v1542_v43, %v3083_v31  ;;  %v722_v11 = vmul.f32 1.442695, %v682_v19 }
 0x16c   : > { %1563 = vrcp.f32 %v1006_v6  ;;  %v1546_v2 = vpop.eup %1545  ;;  %v1005_v0 = vadd.f32 %v1542_v43, %v972_v60  ;;  %v1074_v42 = vmul.f32 %v1544_v3, %v3084_v63  ;;  %v821_v9 = vmul.f32 1.442695, %v781_v12  ;;  %v3086_v6 = vld [vmem:[#allocation26_spill] sm:$0xff]  ;;  %v3088_v43 = vld [vmem:[#allocation16_spill] sm:$0xff] }
 0x16d   : > { %1565 = vpow2.f32 %v815_v55  ;;  %v1548_v54 = vpop.eup %1547  ;;  %v1137_v4 = vadd.f32 %v1104_v46, %v1071_v26  ;;  %v975_v14 = vadd.f32 %v1546_v2, %v1544_v3  ;;  %v1107_v23 = vmul.f32 %v1546_v2, %v3085_v13  ;;  %v3087_v55 = vld [vmem:[#allocation10_spill] sm:$0xff]  ;;  %v3090_v13 = vld [vmem:[#allocation21_spill] sm:$0xff] }
 0x16e   : > { %1567 = vpow2.f32 %v914_v51  ;;  %v1550_v61 = vpop.eup %1549  ;;  %v1173_v45 = vmul.f32 %v1548_v54, %v3086_v6  ;;  %v920_v29 = vmul.f32 1.442695, %v880_v30  ;;  %v681_v31 = vsub.f32 %v3072_v48, %v2532_v49  ;;  %v3092_v6 = vld [vmem:[#allocation28_spill] sm:$0xff] }
 0x16f   : > { %1569 = vrcp.f32 %v1005_v0  ;;  %v1552_v5 = vpop.eup %1551  ;;  %v1008_v19 = vadd.f32 %v1548_v54, %v975_v14  ;;  %v1140_v10 = vadd.f32 %v1107_v23, %v1074_v42  ;;  %v1073_v12 = vmul.f32 %v1550_v61, %v3087_v55  ;;  %v3089_v42 = vld [vmem:[#allocation14_spill] sm:$0xff] }
 0x170   : > { %1571 = vpow2.f32 %v722_v11  ;;  %v1554_v46 = vpop.eup %1553  ;;  %v974_v26 = vadd.f32 %v1552_v5, %v1550_v61  ;;  %v1106_v2 = vmul.f32 %v1552_v5, %v3088_v43  ;;  %v720_v51 = vmul.f32 1.442695, %v681_v31 }
 0x171   : > { %1573 = vpow2.f32 %v821_v9  ;;  %v1203_v0 = vadd.f32 %v1170_v27, %v1137_v4  ;;  %v1206_v24 = vadd.f32 %v1173_v45, %v1140_v10  ;;  %v780_v48 = vsub.f32 %v3073_v18, %v2532_v49  ;;  %v3091_v27 = vld [vmem:[#allocation27_spill] sm:$0xff] }
 0x172   : > { %v1556_v60 = vpop.eup %1555  ;;  %1575 = vrcp.f32 %v1008_v19  ;;  %v1007_v3 = vadd.f32 %v1554_v46, %v974_v26  ;;  %v1139_v63 = vadd.f32 %v1106_v2, %v1073_v12  ;;  %v1172_v4 = vmul.f32 %v1554_v46, %v3091_v27  ;;  %v3094_v27 = vld [vmem:[#allocation29_spill] sm:$0xff] }
 0x173   : > { %v1558_v30 = vpop.eup %1557  ;;  %v1076_v11 = vmul.f32 %v1556_v60, %v3089_v42  ;;  %1577 = vpow2.f32 %v920_v29  ;;  %v819_v23 = vmul.f32 1.442695, %v780_v48  ;;  %v879_v18 = vsub.f32 %v2509_v28, %v2532_v49  ;;  %v1795_v29 = vld [vmem:[%s2027_s30 + $0x20] sm:$0xff] }
 0x174   : > { %v1560_v54 = vpop.eup %1559  ;;  %v977_v14 = vadd.f32 %v1558_v30, %v1556_v60  ;;  %v1109_v9 = vmul.f32 %v1558_v30, %v3090_v13  ;;  %1579 = vpow2.f32 %v720_v51  ;;  %v684_v43 = vsub.f32 %v2299_v8, %v2538_v32  ;;  %v3093_v49 = vld [vmem:[#allocation18_spill] sm:$0xff] }
 0x175   : > { %v1562_v61 = vpop.eup %1561  ;;  %1581 = vrcp.f32 %v1007_v3  ;;  %v1175_v45 = vmul.f32 %v1560_v54, %v3092_v6  ;;  %v918_v26 = vmul.f32 1.442695, %v879_v18  ;;  %v783_v46 = vsub.f32 %v2403_v57, %v2538_v32  ;;  %v3095_v6 = vld [vmem:[#allocation22_spill] sm:$0xff] }
 0x176   : > { %v1564_v31 = vpop.eup %1563  ;;  %v1010_v5 = vadd.f32 %v1560_v54, %v977_v14  ;;  %v1142_v19 = vadd.f32 %v1109_v9, %v1076_v11  ;;  %v1075_v10 = vmul.f32 %v1795_v29, %v1562_v61  ;;  %1583 = vpow2.f32 %v819_v23  ;;  %v1796_v14 = vld [vmem:[%s2027_s30 + $0x38] sm:$0xff] }
 0x177   : > { %v1566_v55 = vpop.eup %1565  ;;  %v1237_v12 = vmul.f32 %v1564_v31, %v1204_v56  ;;  %v1205_v51 = vadd.f32 %v1172_v4, %v1139_v63  ;;  %v726_v8 = vmul.f32 1.442695, %v684_v43  ;;  %v825_v30 = vmul.f32 1.442695, %v783_v46 }
 0x178   : > { %v1568_v2 = vpop.eup %1567  ;;  %1585 = vrcp.f32 %v1010_v5  ;;  %v976_v28 = vadd.f32 %v1566_v55, %v1562_v61  ;;  %v1108_v60 = vmul.f32 %v1566_v55, %v3093_v49  ;;  %v1208_v56 = vadd.f32 %v1175_v45, %v1142_v19 }
 0x179   : > { %v1570_v48 = vpop.eup %1569  ;;  %1270 = vst [vmem:[%s2578_s3 + $0x8] sm:$0xff] %v1237_v12  ;;  %1587 = vpow2.f32 %v918_v26  ;;  %v882_v11 = vsub.f32 %v2519_v53, %v2538_v32  ;;  %v683_v9 = vsub.f32 %v3078_v41, %v2548_v1  ;;  %v782_v23 = vsub.f32 %v3079_v16, %v2548_v1  ;;  %v566_v53 = vpop.xlane.xlu1 %565  ;;  %v3096_v26 = vld [vmem:[#allocation30_spill] sm:$0xff] }
 0x17a   : > { %v1572_v3 = vpop.eup %1571  ;;  %v1236_v57 = vmul.f32 %v1570_v48, %v1203_v0  ;;  %v1009_v42 = vadd.f32 %v1568_v2, %v976_v28  ;;  %v1141_v63 = vadd.f32 %v1108_v60, %v1075_v10  ;;  %1589 = vpow2.f32 %v726_v8  ;;  %v564_v41 = vpop.xlane.xlu0 %563  ;;  %v1797_v60 = vld [vmem:[%s2027_s30 + $0x30] sm:$0xff] }
 0x17b   : > { %v1574_v54 = vpop.eup %1573  ;;  %v1078_v13 = vmul.f32 %v1796_v14, %v1572_v3  ;;  %v1174_v0 = vmul.f32 %v1568_v2, %v3094_v27  ;;  %v924_v31 = vmul.f32 1.442695, %v882_v11  ;;  %v724_v5 = vmul.f32 1.442695, %v683_v9 }
 0x17c   : > { %v1576_v61 = vpop.eup %1575  ;;  %1269 = vst [vmem:[%s2578_s3] sm:$0xff] %v1236_v57  ;;  %1591 = vrcp.f32 %v1009_v42  ;;  %v979_v4 = vadd.f32 %v1574_v54, %v1572_v3  ;;  %v1111_v45 = vmul.f32 %v1574_v54, %v3095_v6  ;;  %v823_v55 = vmul.f32 1.442695, %v782_v23  ;;  %v3099_v57 = vld [vmem:[#allocation20_spill] sm:$0xff] }
 0x17d   : > { %v1578_v32 = vpop.eup %1577  ;;  %v1239_v18 = vmul.f32 %v1576_v61, %v1206_v24  ;;  %1593 = vpow2.f32 %v825_v30  ;;  %v1207_v29 = vadd.f32 %v1174_v0, %v1141_v63  ;;  %v881_v46 = vsub.f32 %v2525_v25, %v2548_v1  ;;  %v570_v23 = vpop.xlane.xlu1 %569 }
 0x17e   : > { %v1580_v19 = vpop.eup %1579  ;;  %v1012_v16 = vadd.f32 %v1578_v32, %v979_v4  ;;  %v1144_v10 = vadd.f32 %v1111_v45, %v1078_v13  ;;  %v1177_v43 = vmul.f32 %v1578_v32, %v3096_v26  ;;  %1595 = vpow2.f32 %v924_v31  ;;  %v3100_v45 = vld [vmem:[#allocation31_spill] sm:$0xff] }
 0x17f   : > { %v1582_v12 = vpop.eup %1581  ;;  %1272 = vst [vmem:[%s2578_s3 + $0x18] sm:$0xff] %v1239_v18  ;;  %v3097_v24 = vmax.f32 %v2307_v21, %v2407_v50  ;;  %v1077_v48 = vmul.f32 %v1797_v60, %v1580_v19  ;;  %v3098_v8 = vmax.f32 %v2309_v22, %v2401_v7  ;;  %v922_v63 = vmul.f32 1.442695, %v881_v46  ;;  %v3102_v46 = vld [vmem:[#allocation23_spill] sm:$0xff] }
 0x180   : > { %v1584_v28 = vpop.eup %1583  ;;  %v1238_v49 = vmul.f32 %v1582_v12, %v1205_v51  ;;  %1597 = vrcp.f32 %v1012_v16  ;;  %v1210_v13 = vadd.f32 %v1177_v43, %v1144_v10  ;;  %v568_v16 = vpop.xlane.xlu0 %567 }
 0x181   : > { %v653_v2 = vmax.f32 %v3097_v24, %v566_v53  ;;  %v652_v30 = vmax.f32 %v3098_v8, %v564_v41  ;;  %v978_v3 = vadd.f32 %v1584_v28, %v1580_v19  ;;  %v1110_v42 = vmul.f32 %v1584_v28, %v3099_v57 }
 0x182   : > { %1599 = vpow2.f32 %v724_v5  ;;  %v1586_v11 = vpop.eup %1585  ;;  %1271 = vst [vmem:[%s2578_s3 + $0x10] sm:$0xff] %v1238_v49  ;;  %v3103_v49 = vld [vmem:[#allocation52_spill] sm:$0xff] }
 0x183   : > { %1601 = vpow2.f32 %v823_v55  ;;  %v686_v1 = vsub.f32 %v2307_v21, %v653_v2  ;;  %v785_v25 = vsub.f32 %v2407_v50, %v653_v2  ;;  %v884_v51 = vsub.f32 %v566_v53, %v653_v2  ;;  %v1588_v54 = vpop.eup %1587 }
 0x184   : > { %v1241_v14 = vmul.f32 %v1586_v11, %v1208_v56  ;;  %1603 = vpow2.f32 %v922_v63  ;;  %v685_v9 = vsub.f32 %v2309_v22, %v652_v30  ;;  %v1011_v61 = vadd.f32 %v1588_v54, %v978_v3  ;;  %v1590_v6 = vpop.eup %1589  ;;  %v1798_v56 = vld [vmem:[%s2027_s30 + $0x48] sm:$0xff] }
 0x185   : > { %v1143_v27 = vadd.f32 %v1110_v42, %v1077_v48  ;;  %v730_v0 = vmul.f32 1.442695, %v686_v1  ;;  %v829_v4 = vmul.f32 1.442695, %v785_v25  ;;  %v1176_v32 = vmul.f32 %v1588_v54, %v3100_v45  ;;  %v1799_v25 = vld [vmem:[%s2027_s30 + $0x40] sm:$0xff]  ;;  %v2627_v45 = vpop.xlane.xlu0 %571 }
 0x186   : > { %1274 = vst [vmem:[%s2578_s3 + $0x28] sm:$0xff] %v1241_v14  ;;  %v928_v21 = vmul.f32 1.442695, %v884_v51  ;;  %v784_v50 = vsub.f32 %v2401_v7, %v652_v30  ;;  %v883_v53 = vsub.f32 %v564_v41, %v652_v30  ;;  %v1592_v18 = vpop.eup %1591  ;;  %1605 = vrcp.f32 %v1011_v61 }
 0x187   : > { %v1080_v31 = vmul.f32 %v1798_v56, %v1590_v6  ;;  %v728_v5 = vmul.f32 1.442695, %v685_v9  ;;  %v3101_v22 = vmax.f32 %v2315_v33, %v2411_v44  ;;  %v1594_v10 = vpop.eup %1593  ;;  %v1240_v55 = vmul.f32 %v1592_v18, %v1207_v29 }
 0x188   : > { %1607 = vpow2.f32 %v730_v0  ;;  %v827_v12 = vmul.f32 1.442695, %v784_v50  ;;  %v926_v26 = vmul.f32 1.442695, %v883_v53  ;;  %v981_v43 = vadd.f32 %v1594_v10, %v1590_v6  ;;  %v1596_v24 = vpop.eup %1595  ;;  %v574_v0 = vpop.xlane.xlu1 %573 }
 0x189   : > { %v655_v19 = vmax.f32 %v3101_v22, %v570_v23  ;;  %v1113_v7 = vmul.f32 %v1594_v10, %v3102_v46  ;;  %1609 = vpow2.f32 %v829_v4  ;;  %1273 = vst [vmem:[%s2578_s3 + $0x20] sm:$0xff] %v1240_v55  ;;  %v3104_v60 = vmax.f32 %v2317_v36, %v3103_v49  ;;  %v3108_v10 = vld [vmem:[#allocation53_spill] sm:$0xff] }
 0x18a   : > { %1611 = vpow2.f32 %v928_v21  ;;  %v1598_v48 = vpop.eup %1597  ;;  %v1209_v8 = vadd.f32 %v1176_v32, %v1143_v27  ;;  %v1014_v30 = vadd.f32 %v1596_v24, %v981_v43  ;;  %v3106_v21 = vld [vmem:[#allocation33_spill] sm:$0xff]  ;;  %v3109_v55 = vmax.f32 %v2325_v52, %v3108_v10 }
 0x18b   : > { %v688_v41 = vsub.f32 %v2315_v33, %v655_v19  ;;  %v787_v2 = vsub.f32 %v2411_v44, %v655_v19  ;;  %v886_v28 = vsub.f32 %v570_v23, %v655_v19  ;;  %v654_v29 = vmax.f32 %v3104_v60, %v568_v16  ;;  %v3105_v44 = vld [vmem:[#allocation32_spill] sm:$0xff]  ;;  %v1800_v23 = vld [vmem:[%s2027_s30 + $0x148] sm:$0xff] }
 0x18c   : > { %v1146_v3 = vadd.f32 %v1113_v7, %v1080_v31  ;;  %1613 = vpow2.f32 %v728_v5  ;;  %v1600_v57 = vpop.eup %1599  ;;  %v1243_v33 = vmul.f32 %v1598_v48, %v1210_v13  ;;  %v1179_v1 = vmul.f32 %v1596_v24, %v3105_v44  ;;  %v1801_v43 = vld [vmem:[%s2027_s30 + $0x58] sm:$0xff]  ;;  %v3110_v48 = vld [vmem:[#allocation34_spill] sm:$0xff] }
 0x18d   : > { %1615 = vpow2.f32 %v827_v12  ;;  %v734_v42 = vmul.f32 1.442695, %v688_v41  ;;  %v833_v63 = vmul.f32 1.442695, %v787_v2  ;;  %v1602_v11 = vpop.eup %1601  ;;  %v1079_v51 = vmul.f32 %v1799_v25, %v1600_v57 }
 0x18e   : > { %1617 = vrcp.f32 %v1014_v30  ;;  %v932_v54 = vmul.f32 1.442695, %v886_v28  ;;  %v1604_v14 = vpop.eup %1603  ;;  %1276 = vst [vmem:[%s2578_s3 + $0x38] sm:$0xff] %v1243_v33  ;;  %v980_v9 = vadd.f32 %v1602_v11, %v1600_v57  ;;  %v1112_v61 = vmul.f32 %v1800_v23, %v1602_v11  ;;  %v1802_v28 = vld [vmem:[%s2027_s30 + $0x160] sm:$0xff] }
 0x18f   : > { %1619 = vpow2.f32 %v926_v26  ;;  %v687_v27 = vsub.f32 %v2317_v36, %v654_v29  ;;  %v1212_v13 = vadd.f32 %v1179_v1, %v1146_v3  ;;  %v786_v4 = vsub.f32 %v3103_v49, %v654_v29  ;;  %v1804_v1 = vld [vmem:[%s2027_s30 + $0x158] sm:$0xff] }
 0x190   : > { %1621 = vpow2.f32 %v734_v42  ;;  %v885_v6 = vsub.f32 %v568_v16, %v654_v29  ;;  %v1013_v32 = vadd.f32 %v1604_v14, %v980_v9  ;;  %v1178_v50 = vmul.f32 %v1604_v14, %v3106_v21  ;;  %v1606_v18 = vpop.eup %1605  ;;  %v1803_v42 = vld [vmem:[%s2027_s30 + $0x50] sm:$0xff]  ;;  %v3112_v9 = vld [vmem:[#allocation46_spill] sm:$0xff]  ;;  %v578_v21 = vpop.xlane.xlu1 %577 }
 0x191   : > { %1623 = vpow2.f32 %v833_v63  ;;  %v732_v53 = vmul.f32 1.442695, %v687_v27  ;;  %v831_v56 = vmul.f32 1.442695, %v786_v4  ;;  %v3107_v36 = vmax.f32 %v2323_v47, %v2415_v39  ;;  %v3111_v14 = vld [vmem:[#allocation60_spill] sm:$0xff] }
 0x192   : > { %1625 = vpow2.f32 %v932_v54  ;;  %v930_v31 = vmul.f32 1.442695, %v885_v6  ;;  %v1608_v22 = vpop.eup %1607  ;;  %v1242_v19 = vmul.f32 %v1606_v18, %v1209_v8  ;;  %v1145_v16 = vadd.f32 %v1112_v61, %v1079_v51  ;;  %v1805_v18 = vld [vmem:[%s2027_s30 + $0x68] sm:$0xff] }
 0x193   : > { %v657_v5 = vmax.f32 %v3107_v36, %v574_v0  ;;  %1627 = vrcp.f32 %v1013_v32  ;;  %v2637_v12 = vmax.f32 %v3109_v55, %v2627_v45  ;;  %v1610_v26 = vpop.eup %1609  ;;  %v1082_v46 = vmul.f32 %v1801_v43, %v1608_v22 }
 0x194   : > { %1629 = vpow2.f32 %v732_v53  ;;  %v1612_v24 = vpop.eup %1611  ;;  %1275 = vst [vmem:[%s2578_s3 + $0x30] sm:$0xff] %v1242_v19  ;;  %v983_v2 = vadd.f32 %v1610_v26, %v1608_v22  ;;  %v1115_v49 = vmul.f32 %v1802_v28, %v1610_v26  ;;  %v637_v23 = vmax.f32 %v3112_v9, %v3111_v14  ;;  %v1806_v22 = vld [vmem:[%s2027_s30 + $0x170] sm:$0xff] }
 0x195   : > { %v690_v7 = vsub.f32 %v2323_v47, %v657_v5  ;;  %v789_v41 = vsub.f32 %v2415_v39, %v657_v5  ;;  %1631 = vpow2.f32 %v831_v56  ;;  %v888_v60 = vsub.f32 %v574_v0, %v657_v5 }
 0x196   : > { %v1614_v29 = vpop.eup %1613  ;;  %v1181_v8 = vmul.f32 %v1612_v24, %v3110_v48  ;;  %1633 = vpow2.f32 %v930_v31  ;;  %v1016_v33 = vadd.f32 %v1612_v24, %v983_v2  ;;  %v1148_v47 = vadd.f32 %v1115_v49, %v1082_v46  ;;  %v2662_v46 = vpop.xlane.xlu0 %575  ;;  %v1807_v49 = vld [vmem:[%s2027_s30 + $0x60] sm:$0xff] }
 0x197   : > { %v738_v30 = vmul.f32 1.442695, %v690_v7  ;;  %v837_v3 = vmul.f32 1.442695, %v789_v41  ;;  %v1616_v57 = vpop.eup %1615  ;;  %v1081_v39 = vmul.f32 %v1803_v42, %v1614_v29  ;;  %v936_v63 = vmul.f32 1.442695, %v888_v60 }
 0x198   : > { %v1618_v11 = vpop.eup %1617  ;;  %v982_v44 = vadd.f32 %v1616_v57, %v1614_v29  ;;  %v1114_v25 = vmul.f32 %v1804_v1, %v1616_v57  ;;  %v689_v51 = vsub.f32 %v2325_v52, %v2637_v12  ;;  %v788_v27 = vsub.f32 %v3108_v10, %v2637_v12  ;;  %v1808_v57 = vld [vmem:[%s2027_s30 + $0x168] sm:$0xff] }
 0x199   : > { %1635 = vpow2.f32 %v738_v30  ;;  %v1620_v54 = vpop.eup %1619  ;;  %v1245_v61 = vmul.f32 %v1618_v11, %v1212_v13  ;;  %v1211_v4 = vadd.f32 %v1178_v50, %v1145_v16  ;;  %v1214_v6 = vadd.f32 %v1181_v8, %v1148_v47  ;;  %v3113_v16 = vld [vmem:[#allocation35_spill] sm:$0xff]  ;;  %v3115_v8 = vld [vmem:[#allocation36_spill] sm:$0xff] }
 0x19a   : > { %1637 = vrcp.f32 %v1016_v33  ;;  %v1622_v0 = vpop.eup %1621  ;;  %v1015_v32 = vadd.f32 %v1620_v54, %v982_v44  ;;  %v736_v56 = vmul.f32 1.442695, %v689_v51  ;;  %v835_v31 = vmul.f32 1.442695, %v788_v27  ;;  %v3116_v1 = vld [vmem:[#allocation39_spill] sm:$0xff] }
 0x19b   : > { %1639 = vpow2.f32 %v837_v3  ;;  %v1624_v53 = vpop.eup %1623  ;;  %1278 = vst [vmem:[%s2578_s3 + $0x48] sm:$0xff] %v1245_v61  ;;  %v1084_v52 = vmul.f32 %v1805_v18, %v1622_v0  ;;  %v1147_v13 = vadd.f32 %v1114_v25, %v1081_v39  ;;  %v1180_v10 = vmul.f32 %v1620_v54, %v3113_v16  ;;  %v3117_v25 = vld [vmem:[#allocation54_spill] sm:$0xff]  ;;  %v2678_v18 = vpop.xlane.xlu0 %579 }
 0x19c   : > { %1641 = vpow2.f32 %v936_v63  ;;  %v1626_v36 = vpop.eup %1625  ;;  %v985_v5 = vadd.f32 %v1624_v53, %v1622_v0  ;;  %v1117_v19 = vmul.f32 %v1806_v22, %v1624_v53  ;;  %v887_v55 = vsub.f32 %v2627_v45, %v2637_v12  ;;  %v2670_v63 = vpop.xlane.xlu1 %581  ;;  %v1809_v0 = vld [vmem:[%s2027_s30 + $0x270] sm:$0xff]  ;;  %v1811_v22 = vld [vmem:[%s2027_s30 + $0x180] sm:$0xff] }
 0x19d   : > { %1643 = vrcp.f32 %v1015_v32  ;;  %v1628_v50 = vpop.eup %1627  ;;  %v3114_v26 = vmax.f32 %v2331_v62, %v2419_v38  ;;  %v1183_v30 = vmul.f32 %v1626_v36, %v3115_v8  ;;  %v1213_v47 = vadd.f32 %v1180_v10, %v1147_v13  ;;  %v1810_v32 = vld [vmem:[%s2027_s30 + $0x78] sm:$0xff] }
 0x19e   : > { %1645 = vpow2.f32 %v736_v56  ;;  %v1630_v7 = vpop.eup %1629  ;;  %v1244_v41 = vmul.f32 %v1628_v50, %v1211_v4  ;;  %v1018_v24 = vadd.f32 %v1626_v36, %v985_v5  ;;  %v1150_v2 = vadd.f32 %v1117_v19, %v1084_v52 }
 0x19f   : > { %v659_v43 = vmax.f32 %v3114_v26, %v578_v21  ;;  %1647 = vpow2.f32 %v835_v31  ;;  %v1632_v28 = vpop.eup %1631  ;;  %v1083_v60 = vmul.f32 %v1807_v49, %v1630_v7  ;;  %v934_v29 = vmul.f32 1.442695, %v887_v55  ;;  %v3120_v55 = vld [vmem:[#allocation40_spill] sm:$0xff]  ;;  %v3121_v26 = vld [vmem:[#allocation55_spill] sm:$0xff] }
 0x1a0   : > { %v1634_v12 = vpop.eup %1633  ;;  %1277 = vst [vmem:[%s2578_s3 + $0x40] sm:$0xff] %v1244_v41  ;;  %1649 = vrcp.f32 %v1018_v24  ;;  %v984_v3 = vadd.f32 %v1632_v28, %v1630_v7  ;;  %v1116_v33 = vmul.f32 %v1808_v57, %v1632_v28  ;;  %v3118_v51 = vmax.f32 %v3116_v1, %v3117_v25  ;;  %v1812_v28 = vld [vmem:[%s2027_s30 + $0x288] sm:$0xff]  ;;  %v1814_v57 = vld [vmem:[%s2027_s30 + $0x178] sm:$0xff] }
 0x1a1   : > { %v692_v48 = vsub.f32 %v2331_v62, %v659_v43  ;;  %v791_v45 = vsub.f32 %v2419_v38, %v659_v43  ;;  %1651 = vpow2.f32 %v934_v29  ;;  %v1216_v62 = vadd.f32 %v1183_v30, %v1150_v2  ;;  %v1813_v30 = vld [vmem:[%s2027_s30 + $0x70] sm:$0xff] }
 0x1a2   : > { %v1017_v44 = vadd.f32 %v1634_v12, %v984_v3  ;;  %v890_v38 = vsub.f32 %v578_v21, %v659_v43  ;;  %v658_v54 = vmax.f32 %v3118_v51, %v2662_v46  ;;  %v1149_v27 = vadd.f32 %v1116_v33, %v1083_v60 }
 0x1a3   : > { %v742_v42 = vmul.f32 1.442695, %v692_v48  ;;  %v841_v39 = vmul.f32 1.442695, %v791_v45  ;;  %v1636_v11 = vpop.eup %1635  ;;  %v1182_v4 = vmul.f32 %v1809_v0, %v1634_v12  ;;  %v3119_v31 = vmax.f32 %v2339_v17, %v2423_v35 }
 0x1a4   : > { %v1638_v61 = vpop.eup %1637  ;;  %v1086_v53 = vmul.f32 %v1810_v32, %v1636_v11  ;;  %v940_v21 = vmul.f32 1.442695, %v890_v38  ;;  %v691_v50 = vsub.f32 %v3116_v1, %v658_v54  ;;  %v889_v10 = vsub.f32 %v2662_v46, %v658_v54 }
 0x1a5   : > { %1653 = vpow2.f32 %v742_v42  ;;  %v1640_v52 = vpop.eup %1639  ;;  %v1247_v56 = vmul.f32 %v1638_v61, %v1214_v6  ;;  %v661_v36 = vmax.f32 %v3119_v31, %v2670_v63  ;;  %v790_v6 = vsub.f32 %v3117_v25, %v658_v54  ;;  %v586_v61 = vpop.xlane.xlu1 %585 }
 0x1a6   : > { %1655 = vrcp.f32 %v1017_v44  ;;  %v1642_v13 = vpop.eup %1641  ;;  %v987_v5 = vadd.f32 %v1640_v52, %v1636_v11  ;;  %v1119_v19 = vmul.f32 %v1811_v22, %v1640_v52  ;;  %v3122_v43 = vmax.f32 %v3120_v55, %v3121_v26 }
 0x1a7   : > { %1657 = vpow2.f32 %v841_v39  ;;  %v1644_v16 = vpop.eup %1643  ;;  %1280 = vst [vmem:[%s2578_s3 + $0x58] sm:$0xff] %v1247_v56  ;;  %v1185_v49 = vmul.f32 %v1812_v28, %v1642_v13  ;;  %v740_v60 = vmul.f32 1.442695, %v691_v50  ;;  %v839_v45 = vmul.f32 1.442695, %v790_v6  ;;  %v584_v6 = vpop.xlane.xlu0 %583 }
 0x1a8   : > { %1659 = vpow2.f32 %v940_v21  ;;  %v660_v7 = vmax.f32 %v3122_v43, %v2678_v18  ;;  %v1646_v41 = vpop.eup %1645  ;;  %v1246_v24 = vmul.f32 %v1644_v16, %v1213_v47  ;;  %v1020_v2 = vadd.f32 %v1642_v13, %v987_v5 }
 0x1a9   : > { %v1648_v29 = vpop.eup %1647  ;;  %v1152_v48 = vadd.f32 %v1119_v19, %v1086_v53  ;;  %v938_v12 = vmul.f32 1.442695, %v889_v10  ;;  %v694_v8 = vsub.f32 %v2339_v17, %v661_v36  ;;  %v1085_v3 = vmul.f32 %v1813_v30, %v1646_v41  ;;  %v1816_v19 = vld [vmem:[%s2027_s30 + $0x190] sm:$0xff]  ;;  %v1817_v10 = vld [vmem:[%s2027_s30 + $0x280] sm:$0xff] }
 0x1aa   : > { %1279 = vst [vmem:[%s2578_s3 + $0x50] sm:$0xff] %v1246_v24  ;;  %1661 = vrcp.f32 %v1020_v2  ;;  %v986_v46 = vadd.f32 %v1648_v29, %v1646_v41  ;;  %v1118_v33 = vmul.f32 %v1814_v57, %v1648_v29  ;;  %v1650_v42 = vpop.eup %1649  ;;  %v793_v39 = vsub.f32 %v2423_v35, %v661_v36 }
 0x1ab   : > { %1663 = vpow2.f32 %v740_v60  ;;  %v746_v47 = vmul.f32 1.442695, %v694_v8  ;;  %v892_v11 = vsub.f32 %v2670_v63, %v661_v36  ;;  %v1652_v44 = vpop.eup %1651  ;;  %v1249_v38 = vmul.f32 %v1650_v42, %v1216_v62  ;;  %v3124_v60 = vld [vmem:[#allocation56_spill] sm:$0xff] }
 0x1ac   : > { %v1215_v1 = vadd.f32 %v1182_v4, %v1149_v27  ;;  %1665 = vpow2.f32 %v839_v45  ;;  %v693_v17 = vsub.f32 %v3120_v55, %v660_v7  ;;  %v1218_v25 = vadd.f32 %v1185_v49, %v1152_v48  ;;  %v1815_v27 = vld [vmem:[%s2027_s30 + $0x88] sm:$0xff] }
 0x1ad   : > { %v1019_v51 = vadd.f32 %v1652_v44, %v986_v46  ;;  %1667 = vpow2.f32 %v938_v12  ;;  %v845_v54 = vmul.f32 1.442695, %v793_v39  ;;  %1282 = vst [vmem:[%s2578_s3 + $0x68] sm:$0xff] %v1249_v38  ;;  %v944_v32 = vmul.f32 1.442695, %v892_v11  ;;  %v1819_v46 = vld [vmem:[%s2027_s30 + $0x80] sm:$0xff] }
 0x1ae   : > { %1669 = vpow2.f32 %v746_v47  ;;  %v744_v35 = vmul.f32 1.442695, %v693_v17  ;;  %v792_v63 = vsub.f32 %v3121_v26, %v660_v7  ;;  %v1151_v62 = vadd.f32 %v1118_v33, %v1085_v3  ;;  %v1820_v47 = vld [vmem:[%s2027_s30 + $0x188] sm:$0xff] }
 0x1af   : > { %v1654_v0 = vpop.eup %1653  ;;  %1671 = vrcp.f32 %v1019_v51  ;;  %v891_v52 = vsub.f32 %v2678_v18, %v660_v7  ;;  %v3123_v36 = vmax.f32 %v2347_v37, %v2427_v34  ;;  %v1184_v55 = vmul.f32 %v1817_v10, %v1652_v44  ;;  %v1818_v7 = vld [vmem:[%s2027_s30 + $0x298] sm:$0xff]  ;;  %v590_v44 = vpop.xlane.xlu1 %589  ;;  %v3127_v17 = vld [vmem:[#allocation43_spill] sm:$0xff] }
 0x1b0   : > { %v1656_v53 = vpop.eup %1655  ;;  %v1088_v4 = vmul.f32 %v1815_v27, %v1654_v0  ;;  %1673 = vpow2.f32 %v845_v54  ;;  %v843_v31 = vmul.f32 1.442695, %v792_v63  ;;  %v3125_v29 = vmax.f32 %v2349_v40, %v3124_v60  ;;  %v1821_v27 = vld [vmem:[%s2027_s30 + $0x290] sm:$0xff] }
 0x1b1   : > { %v1658_v56 = vpop.eup %1657  ;;  %v1248_v21 = vmul.f32 %v1656_v53, %v1215_v1  ;;  %v663_v13 = vmax.f32 %v3123_v36, %v586_v61  ;;  %1675 = vpow2.f32 %v944_v32  ;;  %v942_v16 = vmul.f32 1.442695, %v891_v52  ;;  %v3126_v1 = vld [vmem:[#allocation61_spill] sm:$0xff] }
 0x1b2   : > { %v1660_v5 = vpop.eup %1659  ;;  %v989_v22 = vadd.f32 %v1658_v56, %v1654_v0  ;;  %v1121_v50 = vmul.f32 %v1816_v19, %v1658_v56  ;;  %1677 = vpow2.f32 %v744_v35  ;;  %v662_v48 = vmax.f32 %v3125_v29, %v584_v6  ;;  %v1823_v19 = vld [vmem:[%s2027_s30 + $0x1a0] sm:$0xff] }
 0x1b3   : > { %1281 = vst [vmem:[%s2578_s3 + $0x60] sm:$0xff] %v1248_v21  ;;  %v696_v18 = vsub.f32 %v2347_v37, %v663_v13  ;;  %v795_v26 = vsub.f32 %v2427_v34, %v663_v13  ;;  %v1187_v41 = vmul.f32 %v1818_v7, %v1660_v5  ;;  %1679 = vpow2.f32 %v843_v31 }
 0x1b4   : > { %v1022_v43 = vadd.f32 %v1660_v5, %v989_v22  ;;  %v894_v24 = vsub.f32 %v586_v61, %v663_v13  ;;  %v1662_v2 = vpop.eup %1661  ;;  %1681 = vpow2.f32 %v942_v16  ;;  %v1154_v34 = vadd.f32 %v1121_v50, %v1088_v4  ;;  %v1822_v13 = vld [vmem:[%s2027_s30 + $0x98] sm:$0xff] }
 0x1b5   : > { %v750_v28 = vmul.f32 1.442695, %v696_v18  ;;  %v849_v49 = vmul.f32 1.442695, %v795_v26  ;;  %v1664_v45 = vpop.eup %1663  ;;  %v1251_v37 = vmul.f32 %v1662_v2, %v1218_v25  ;;  %v695_v3 = vsub.f32 %v2349_v40, %v662_v48  ;;  %v1824_v18 = vld [vmem:[%s2027_s30 + $0x90] sm:$0xff]  ;;  %v1825_v2 = vld [vmem:[%s2027_s30 + $0x198] sm:$0xff] }
 0x1b6   : > { %1683 = vrcp.f32 %v1022_v43  ;;  %v948_v12 = vmul.f32 1.442695, %v894_v24  ;;  %v1666_v8 = vpop.eup %1665  ;;  %v1087_v30 = vmul.f32 %v1819_v46, %v1664_v45  ;;  %v794_v57 = vsub.f32 %v3124_v60, %v662_v48 }
 0x1b7   : > { %1685 = vpow2.f32 %v750_v28  ;;  %v1668_v33 = vpop.eup %1667  ;;  %1284 = vst [vmem:[%s2578_s3 + $0x78] sm:$0xff] %v1251_v37  ;;  %v988_v42 = vadd.f32 %v1666_v8, %v1664_v45  ;;  %v1120_v39 = vmul.f32 %v1820_v47, %v1666_v8  ;;  %v893_v11 = vsub.f32 %v584_v6, %v662_v48 }
 0x1b8   : > { %1687 = vpow2.f32 %v849_v49  ;;  %v1670_v38 = vpop.eup %1669  ;;  %v636_v25 = vmax.f32 %v3127_v17, %v3126_v1  ;;  %v1217_v51 = vadd.f32 %v1184_v55, %v1151_v62  ;;  %v748_v54 = vmul.f32 1.442695, %v695_v3  ;;  %v2728_v62 = vpop.xlane.xlu0 %587 }
 0x1b9   : > { %v847_v61 = vmul.f32 1.442695, %v794_v57  ;;  %v1672_v0 = vpop.eup %1671  ;;  %v1220_v40 = vadd.f32 %v1187_v41, %v1154_v34  ;;  %v1021_v32 = vadd.f32 %v1668_v33, %v988_v42  ;;  %1689 = vpow2.f32 %v948_v12  ;;  %v1827_v42 = vld [vmem:[%s2027_s30 + $0x2a0] sm:$0xff] }
 0x1ba   : > { %v946_v35 = vmul.f32 1.442695, %v893_v11  ;;  %v1674_v63 = vpop.eup %1673  ;;  %v1250_v53 = vmul.f32 %v1672_v0, %v1217_v51  ;;  %v1186_v4 = vmul.f32 %v1821_v27, %v1668_v33  ;;  %1691 = vpow2.f32 %v748_v54  ;;  %v594_v33 = vpop.xlane.xlu1 %593  ;;  %v1828_v11 = vld [vmem:[%s2027_s30 + $0xa8] sm:$0xff]  ;;  %v1829_v54 = vld [vmem:[%s2027_s30 + $0x1b0] sm:$0xff] }
 0x1bb   : > { %v3128_v52 = vmax.f32 %v2355_v58, %v2431_v20  ;;  %v1676_v21 = vpop.eup %1675  ;;  %1693 = vrcp.f32 %v1021_v32  ;;  %v1153_v31 = vadd.f32 %v1120_v39, %v1087_v30  ;;  %v991_v36 = vadd.f32 %v1674_v63, %v1670_v38  ;;  %v3131_v27 = vld [vmem:[#allocation59_spill] sm:$0xff] }
 0x1bc   : > { %v1090_v5 = vmul.f32 %v1822_v13, %v1670_v38  ;;  %v1678_v22 = vpop.eup %1677  ;;  %1283 = vst [vmem:[%s2578_s3 + $0x70] sm:$0xff] %v1250_v53  ;;  %v1123_v50 = vmul.f32 %v1823_v19, %v1674_v63  ;;  %1695 = vpow2.f32 %v847_v61  ;;  %v3129_v43 = vmax.f32 %v2357_v59, %v2425_v15  ;;  %v2746_v38 = vpop.xlane.xlu0 %591  ;;  %v3130_v53 = vld [vmem:[#allocation41_spill] sm:$0xff] }
 0x1bd   : > { %v665_v56 = vmax.f32 %v3128_v52, %v590_v44  ;;  %v1680_v10 = vpop.eup %1679  ;;  %v1024_v55 = vadd.f32 %v1676_v21, %v991_v36  ;;  %v1089_v26 = vmul.f32 %v1824_v18, %v1678_v22  ;;  %1697 = vpow2.f32 %v946_v35  ;;  %v3133_v36 = vld [vmem:[#allocation42_spill] sm:$0xff]  ;;  %v3134_v13 = vld [vmem:[#allocation57_spill] sm:$0xff] }
 0x1be   : > { %v664_v7 = vmax.f32 %v3129_v43, %v2728_v62  ;;  %v1682_v41 = vpop.eup %1681  ;;  %v990_v24 = vadd.f32 %v1680_v10, %v1678_v22  ;;  %v1122_v28 = vmul.f32 %v1825_v2, %v1680_v10  ;;  %v1219_v29 = vadd.f32 %v1186_v4, %v1153_v31 }
 0x1bf   : > { %v698_v16 = vsub.f32 %v2355_v58, %v665_v56  ;;  %v797_v6 = vsub.f32 %v2431_v20, %v665_v56  ;;  %1699 = vrcp.f32 %v1024_v55  ;;  %v1826_v20 = vld [vmem:[%s2027_s30 + $0x2a8] sm:$0xff]  ;;  %v896_v45 = vsub.f32 %v590_v44, %v665_v56 }
 0x1c0   : > { %v1684_v58 = vpop.eup %1683  ;;  %v1189_v48 = vmul.f32 %v1826_v20, %v1676_v21  ;;  %v1156_v12 = vadd.f32 %v1123_v50, %v1090_v5  ;;  %v1023_v8 = vadd.f32 %v1682_v41, %v990_v24  ;;  %v1155_v30 = vadd.f32 %v1122_v28, %v1089_v26  ;;  %v1831_v26 = vld [vmem:[%s2027_s30 + $0xa0] sm:$0xff] }
 0x1c1   : > { %v754_v49 = vmul.f32 1.442695, %v698_v16  ;;  %v853_v60 = vmul.f32 1.442695, %v797_v6  ;;  %v1686_v37 = vpop.eup %1685  ;;  %v1253_v34 = vmul.f32 %v1684_v58, %v1220_v40  ;;  %v952_v3 = vmul.f32 1.442695, %v896_v45 }
 0x1c2   : > { %v1688_v46 = vpop.eup %1687  ;;  %v697_v57 = vsub.f32 %v2357_v59, %v664_v7  ;;  %v1188_v47 = vmul.f32 %v1827_v42, %v1682_v41  ;;  %v1092_v44 = vmul.f32 %v1828_v11, %v1686_v37  ;;  %v796_v40 = vsub.f32 %v2425_v15, %v664_v7 }
 0x1c3   : > { %1701 = vpow2.f32 %v754_v49  ;;  %1286 = vst [vmem:[%s2578_s3 + $0x88] sm:$0xff] %v1253_v34  ;;  %v993_v39 = vadd.f32 %v1688_v46, %v1686_v37  ;;  %v1690_v51 = vpop.eup %1689  ;;  %v1125_v61 = vmul.f32 %v1829_v54, %v1688_v46  ;;  %v1222_v59 = vadd.f32 %v1189_v48, %v1156_v12  ;;  %v598_v34 = vpop.xlane.xlu1 %597  ;;  %v1833_v46 = vld [vmem:[%s2027_s30 + $0x2b0] sm:$0xff] }
 0x1c4   : > { %1703 = vpow2.f32 %v853_v60  ;;  %v752_v0 = vmul.f32 1.442695, %v697_v57  ;;  %v1692_v32 = vpop.eup %1691  ;;  %v895_v63 = vsub.f32 %v2728_v62, %v664_v7  ;;  %v3132_v4 = vmax.f32 %v3130_v53, %v3131_v27  ;;  %v1830_v62 = vld [vmem:[%s2027_s30 + $0x2b8] sm:$0xff]  ;;  %v1832_v7 = vld [vmem:[%s2027_s30 + $0x1a8] sm:$0xff]  ;;  %v2767_v57 = vpop.xlane.xlu0 %595 }
 0x1c5   : > { %1705 = vrcp.f32 %v1023_v8  ;;  %v1026_v35 = vadd.f32 %v1690_v51, %v993_v39  ;;  %v1694_v56 = vpop.eup %1693  ;;  %v1221_v21 = vadd.f32 %v1188_v47, %v1155_v30  ;;  %v851_v31 = vmul.f32 1.442695, %v796_v40 }
 0x1c6   : > { %1707 = vpow2.f32 %v952_v3  ;;  %v667_v52 = vmax.f32 %v3132_v4, %v594_v33  ;;  %v3135_v5 = vmax.f32 %v3133_v36, %v3134_v13  ;;  %v1696_v22 = vpop.eup %1695  ;;  %v1252_v19 = vmul.f32 %v1694_v56, %v1219_v29 }
 0x1c7   : > { %1709 = vpow2.f32 %v752_v0  ;;  %v1191_v50 = vmul.f32 %v1830_v62, %v1690_v51  ;;  %v950_v16 = vmul.f32 1.442695, %v895_v63  ;;  %v1698_v6 = vpop.eup %1697  ;;  %v1158_v10 = vadd.f32 %v1125_v61, %v1092_v44  ;;  %v1834_v0 = vld [vmem:[%s2027_s30 + $0xb8] sm:$0xff] }
 0x1c8   : > { %v666_v15 = vmax.f32 %v3135_v5, %v2746_v38  ;;  %1711 = vrcp.f32 %v1026_v35  ;;  %v992_v55 = vadd.f32 %v1696_v22, %v1692_v32  ;;  %v700_v18 = vsub.f32 %v3130_v53, %v667_v52  ;;  %1285 = vst [vmem:[%s2578_s3 + $0x80] sm:$0xff] %v1252_v19 }
 0x1c9   : > { %1713 = vpow2.f32 %v851_v31  ;;  %v1091_v43 = vmul.f32 %v1831_v26, %v1692_v32  ;;  %v1124_v41 = vmul.f32 %v1832_v7, %v1696_v22  ;;  %v799_v24 = vsub.f32 %v3131_v27, %v667_v52  ;;  %v1700_v28 = vpop.eup %1699  ;;  %v1835_v32 = vld [vmem:[%s2027_s30 + $0x1c0] sm:$0xff]  ;;  %v602_v31 = vpop.xlane.xlu1 %601  ;;  %v1837_v7 = vld [vmem:[%s2027_s30 + $0x1b8] sm:$0xff] }
 0x1ca   : > { %v898_v2 = vsub.f32 %v594_v33, %v667_v52  ;;  %v1025_v49 = vadd.f32 %v1698_v6, %v992_v55  ;;  %1715 = vpow2.f32 %v950_v16  ;;  %v758_v60 = vmul.f32 1.442695, %v700_v18  ;;  %v3137_v52 = vld [vmem:[#allocation45_spill] sm:$0xff]  ;;  %v2781_v22 = vpop.xlane.xlu0 %599 }
 0x1cb   : > { %v699_v58 = vsub.f32 %v3133_v36, %v666_v15  ;;  %v1255_v20 = vmul.f32 %v1700_v28, %v1222_v59  ;;  %v857_v48 = vmul.f32 1.442695, %v799_v24  ;;  %v798_v37 = vsub.f32 %v3134_v13, %v666_v15 }
 0x1cc   : > { %v956_v45 = vmul.f32 1.442695, %v898_v2  ;;  %v1224_v8 = vadd.f32 %v1191_v50, %v1158_v10  ;;  %1717 = vrcp.f32 %v1025_v49  ;;  %v1190_v30 = vmul.f32 %v1833_v46, %v1698_v6  ;;  %v1836_v50 = vld [vmem:[%s2027_s30 + $0xb0] sm:$0xff]  ;;  %v3139_v10 = vld [vmem:[#allocation58_spill] sm:$0xff] }
 0x1cd   : > { %v1702_v29 = vpop.eup %1701  ;;  %v756_v3 = vmul.f32 1.442695, %v699_v58  ;;  %1288 = vst [vmem:[%s2578_s3 + $0x98] sm:$0xff] %v1255_v20  ;;  %v1157_v42 = vadd.f32 %v1124_v41, %v1091_v43  ;;  %1719 = vpow2.f32 %v758_v60  ;;  %v855_v39 = vmul.f32 1.442695, %v798_v37  ;;  %v3138_v6 = vld [vmem:[#allocation44_spill] sm:$0xff] }
 0x1ce   : > { %v1704_v12 = vpop.eup %1703  ;;  %1721 = vpow2.f32 %v857_v48  ;;  %v897_v51 = vsub.f32 %v2746_v38, %v666_v15  ;;  %v669_v54 = vmax.f32 %v636_v25, %v598_v34  ;;  %v1094_v40 = vmul.f32 %v1834_v0, %v1702_v29  ;;  %v3136_v38 = vld [vmem:[#allocation63_spill] sm:$0xff] }
 0x1cf   : > { %v1706_v33 = vpop.eup %1705  ;;  %v995_v47 = vadd.f32 %v1704_v12, %v1702_v29  ;;  %v1127_v59 = vmul.f32 %v1835_v32, %v1704_v12  ;;  %1723 = vpow2.f32 %v956_v45  ;;  %v638_v56 = vmax.f32 %v3137_v52, %v3136_v38  ;;  %v1838_v20 = vld [vmem:[%s2027_s30 + $0x2c8] sm:$0xff] }
 0x1d0   : > { %v1708_v11 = vpop.eup %1707  ;;  %v1254_v44 = vmul.f32 %v1706_v33, %v1221_v21  ;;  %1725 = vpow2.f32 %v756_v3  ;;  %v954_v63 = vmul.f32 1.442695, %v897_v51  ;;  %v702_v53 = vsub.f32 %v3127_v17, %v669_v54  ;;  %v1839_v51 = vld [vmem:[%s2027_s30 + $0xc8] sm:$0xff] }
 0x1d1   : > { %v1028_v61 = vadd.f32 %v1708_v11, %v995_v47  ;;  %v1710_v35 = vpop.eup %1709  ;;  %v801_v27 = vsub.f32 %v3126_v1, %v669_v54  ;;  %v1223_v25 = vadd.f32 %v1190_v30, %v1157_v42  ;;  %v900_v21 = vsub.f32 %v598_v34, %v669_v54 }
 0x1d2   : > { %1287 = vst [vmem:[%s2578_s3 + $0x90] sm:$0xff] %v1254_v44  ;;  %v1712_v4 = vpop.eup %1711  ;;  %v762_v5 = vmul.f32 1.442695, %v702_v53  ;;  %v1160_v17 = vadd.f32 %v1127_v59, %v1094_v40  ;;  %v1093_v16 = vmul.f32 %v1836_v50, %v1710_v35  ;;  %v3140_v55 = vmax.f32 %v3138_v6, %v3139_v10  ;;  %v3141_v53 = vld [vmem:[#allocation62_spill] sm:$0xff] }
 0x1d3   : > { %1727 = vrcp.f32 %v1028_v61  ;;  %v1714_v36 = vpop.eup %1713  ;;  %v1257_v13 = vmul.f32 %v1712_v4, %v1224_v8  ;;  %v861_v15 = vmul.f32 1.442695, %v801_v27  ;;  %v960_v19 = vmul.f32 1.442695, %v900_v21  ;;  %v1840_v61 = vld [vmem:[%s2027_s30 + $0x1d0] sm:$0xff]  ;;  %v3144_v21 = vld [vmem:[#allocation49_spill] sm:$0xff] }
 0x1d4   : > { %1729 = vpow2.f32 %v855_v39  ;;  %v994_v1 = vadd.f32 %v1714_v36, %v1710_v35  ;;  %v1716_v62 = vpop.eup %1715  ;;  %v668_v18 = vmax.f32 %v3140_v55, %v2767_v57  ;;  %v671_v26 = vmax.f32 %v638_v56, %v602_v31  ;;  %v3142_v27 = vld [vmem:[#allocation48_spill] sm:$0xff] }
 0x1d5   : > { %1731 = vpow2.f32 %v954_v63  ;;  %1290 = vst [vmem:[%s2578_s3 + $0xa8] sm:$0xff] %v1257_v13  ;;  %v1126_v41 = vmul.f32 %v1837_v7, %v1714_v36  ;;  %v2794_v24 = vmax.f32 %v637_v23, %v2781_v22  ;;  %v1193_v48 = vmul.f32 %v1838_v20, %v1708_v11  ;;  %v1843_v7 = vld [vmem:[%s2027_s30 + $0xc0] sm:$0xff] }
 0x1d6   : > { %1733 = vpow2.f32 %v762_v5  ;;  %v1027_v43 = vadd.f32 %v1716_v62, %v994_v1  ;;  %v1718_v2 = vpop.eup %1717  ;;  %v701_v28 = vsub.f32 %v3138_v6, %v668_v18  ;;  %v800_v49 = vsub.f32 %v3139_v10, %v668_v18  ;;  %v2815_v5 = vpop.xlane.xlu0 %603  ;;  %v3146_v1 = vld [vmem:[#allocation47_spill] sm:$0xff] }
 0x1d7   : > { %1735 = vpow2.f32 %v861_v15  ;;  %v899_v60 = vsub.f32 %v2767_v57, %v668_v18  ;;  %v1720_v58 = vpop.eup %1719  ;;  %v1256_v29 = vmul.f32 %v1718_v2, %v1223_v25  ;;  %v704_v45 = vsub.f32 %v3137_v52, %v671_v26  ;;  %v3143_v25 = vld [vmem:[#allocation64_spill] sm:$0xff]  ;;  %v606_v18 = vpop.xlane.xlu1 %605 }
 0x1d8   : > { %1737 = vpow2.f32 %v960_v19  ;;  %v1722_v37 = vpop.eup %1721  ;;  %v760_v34 = vmul.f32 1.442695, %v701_v28  ;;  %v859_v23 = vmul.f32 1.442695, %v800_v49  ;;  %v1226_v46 = vadd.f32 %v1193_v48, %v1160_v17  ;;  %v3145_v17 = vld [vmem:[#allocation65_spill] sm:$0xff]  ;;  %v1844_v49 = vld [vmem:[%s2027_s30 + $0x1c8] sm:$0xff] }
 0x1d9   : > { %1739 = vrcp.f32 %v1027_v43  ;;  %v958_v12 = vmul.f32 1.442695, %v899_v60  ;;  %v1724_v8 = vpop.eup %1723  ;;  %1289 = vst [vmem:[%s2578_s3 + $0xa0] sm:$0xff] %v1256_v29  ;;  %v1159_v30 = vadd.f32 %v1126_v41, %v1093_v16  ;;  %v997_v3 = vadd.f32 %v1722_v37, %v1720_v58 }
 0x1da   : > { %v803_v57 = vsub.f32 %v3136_v38, %v671_v26  ;;  %v1726_v33 = vpop.eup %1725  ;;  %1741 = vpow2.f32 %v760_v34  ;;  %v766_v42 = vmul.f32 1.442695, %v704_v45  ;;  %v902_v47 = vsub.f32 %v602_v31, %v671_v26  ;;  %v1841_v38 = vld [vmem:[%s2027_s30 + $0x2c0] sm:$0xff]  ;;  %v1845_v34 = vld [vmem:[%s2027_s30 + $0xd8] sm:$0xff] }
 0x1db   : > { %v703_v39 = vsub.f32 %v3112_v9, %v2794_v24  ;;  %v1030_v44 = vadd.f32 %v1724_v8, %v997_v3  ;;  %v1096_v54 = vmul.f32 %v1839_v51, %v1720_v58  ;;  %v1129_v0 = vmul.f32 %v1840_v61, %v1722_v37 }
 0x1dc   : > { %1743 = vpow2.f32 %v859_v23  ;;  %v865_v59 = vmul.f32 1.442695, %v803_v57  ;;  %v964_v35 = vmul.f32 1.442695, %v902_v47  ;;  %v639_v4 = vmax.f32 %v3142_v27, %v3141_v53 }
 0x1dd   : > { %v1728_v11 = vpop.eup %1727  ;;  %1745 = vpow2.f32 %v958_v12  ;;  %v1192_v52 = vmul.f32 %v1841_v38, %v1716_v62  ;;  %v641_v31 = vmax.f32 %v3144_v21, %v3143_v25  ;;  %v764_v36 = vmul.f32 1.442695, %v703_v39  ;;  %v2831_v12 = vpop.xlane.xlu0 %607  ;;  %v1848_v38 = vld [vmem:[%s2027_s30 + $0xd0] sm:$0xff] }
 0x1de   : > { %v1730_v40 = vpop.eup %1729  ;;  %v1259_v32 = vmul.f32 %v1728_v11, %v1226_v46  ;;  %1747 = vrcp.f32 %v1030_v44  ;;  %v802_v13 = vsub.f32 %v3111_v14, %v2794_v24  ;;  %v640_v19 = vmax.f32 %v3146_v1, %v3145_v17  ;;  %v1842_v14 = vld [vmem:[%s2027_s30 + $0x2d8] sm:$0xff]  ;;  %v1847_v46 = vld [vmem:[%s2027_s30 + $0x2d0] sm:$0xff] }
 0x1df   : > { %v1732_v63 = vpop.eup %1731  ;;  %v996_v9 = vadd.f32 %v1730_v40, %v1726_v33  ;;  %1749 = vpow2.f32 %v766_v42  ;;  %v1225_v62 = vadd.f32 %v1192_v52, %v1159_v30  ;;  %v1162_v6 = vadd.f32 %v1129_v0, %v1096_v54 }
 0x1e0   : > { %v1734_v56 = vpop.eup %1733  ;;  %1292 = vst [vmem:[%s2578_s3 + $0xb8] sm:$0xff] %v1259_v32  ;;  %1751 = vpow2.f32 %v865_v59  ;;  %v863_v55 = vmul.f32 1.442695, %v802_v13  ;;  %v1195_v43 = vmul.f32 %v1842_v14, %v1724_v8  ;;  %v1095_v41 = vmul.f32 %v1843_v7, %v1726_v33  ;;  %v1851_v7 = vld [vmem:[%s2027_s30 + $0xe8] sm:$0xff] }
 0x1e1   : > { %v1736_v15 = vpop.eup %1735  ;;  %v1029_v50 = vadd.f32 %v1732_v63, %v996_v9  ;;  %1753 = vpow2.f32 %v964_v35  ;;  %v901_v2 = vsub.f32 %v2781_v22, %v2794_v24  ;;  %v1128_v60 = vmul.f32 %v1844_v49, %v1730_v40  ;;  %v1846_v22 = vld [vmem:[%s2027_s30 + $0x1e0] sm:$0xff]  ;;  %v1849_v9 = vld [vmem:[%s2027_s30 + $0x1d8] sm:$0xff] }
 0x1e2   : > { %v2819_v16 = vpop.eup %1737  ;;  %v999_v10 = vadd.f32 %v1736_v15, %v1734_v56  ;;  %v673_v20 = vmax.f32 %v640_v19, %v606_v18  ;;  %v672_v48 = vmax.f32 %v639_v4, %v2815_v5  ;;  %v1228_v37 = vadd.f32 %v1195_v43, %v1162_v6 }
 0x1e3   : > { %v1740_v26 = vpop.eup %1739  ;;  %1755 = vrcp.f32 %v1029_v50  ;;  %v962_v29 = vmul.f32 1.442695, %v901_v2  ;;  %v1098_v23 = vmul.f32 %v1845_v34, %v1734_v56  ;;  %v1131_v24 = vmul.f32 %v1846_v22, %v1736_v15  ;;  %v1850_v15 = vld [vmem:[%s2027_s30 + $0x2e8] sm:$0xff] }
 0x1e4   : > { %v1258_v28 = vmul.f32 %v1740_v26, %v1225_v62  ;;  %v1032_v58 = vadd.f32 %v2819_v16, %v999_v10  ;;  %1757 = vpow2.f32 %v764_v36  ;;  %v1742_v45 = vpop.eup %1741  ;;  %v1194_v30 = vmul.f32 %v1847_v46, %v1732_v63 }
 0x1e5   : > { %1759 = vpow2.f32 %v863_v55  ;;  %v706_v3 = vsub.f32 %v3146_v1, %v673_v20  ;;  %v805_v57 = vsub.f32 %v3145_v17, %v673_v20  ;;  %v1161_v42 = vadd.f32 %v1128_v60, %v1095_v41  ;;  %v1852_v41 = vld [vmem:[%s2027_s30 + $0x1f0] sm:$0xff] }
 0x1e6   : > { %1291 = vst [vmem:[%s2578_s3 + $0xb0] sm:$0xff] %v1258_v28  ;;  %1761 = vrcp.f32 %v1032_v58  ;;  %v1744_v8 = vpop.eup %1743  ;;  %v904_v39 = vsub.f32 %v606_v18, %v673_v20  ;;  %v705_v11 = vsub.f32 %v3142_v27, %v672_v48  ;;  %v804_v61 = vsub.f32 %v3141_v53, %v672_v48 }
 0x1e7   : > { %1763 = vpow2.f32 %v962_v29  ;;  %v1746_v33 = vpop.eup %1745  ;;  %v998_v47 = vadd.f32 %v1744_v8, %v1742_v45  ;;  %v770_v51 = vmul.f32 1.442695, %v706_v3  ;;  %v869_v54 = vmul.f32 1.442695, %v805_v57  ;;  %v1853_v29 = vld [vmem:[%s2027_s30 + $0x2e0] sm:$0xff]  ;;  %v1856_v57 = vld [vmem:[%s2027_s30 + $0x2f8] sm:$0xff] }
 0x1e8   : > { %v1748_v44 = vpop.eup %1747  ;;  %v674_v0 = vmax.f32 %v641_v31, %v2831_v12  ;;  %v1164_v59 = vadd.f32 %v1131_v24, %v1098_v23  ;;  %v968_v63 = vmul.f32 1.442695, %v904_v39  ;;  %v1097_v52 = vmul.f32 %v1848_v38, %v1742_v45  ;;  %v1854_v24 = vld [vmem:[%s2027_s30 + $0xe0] sm:$0xff]  ;;  %v1858_v38 = vld [vmem:[%s2027_s30 + $0xf8] sm:$0xff] }
 0x1e9   : > { %v1750_v40 = vpop.eup %1749  ;;  %v1261_v32 = vmul.f32 %v1748_v44, %v1228_v37  ;;  %v1031_v35 = vadd.f32 %v1746_v33, %v998_v47  ;;  %v1130_v56 = vmul.f32 %v1849_v9, %v1744_v8  ;;  %1765 = vpow2.f32 %v770_v51  ;;  %v1859_v9 = vld [vmem:[%s2027_s30 + $0x200] sm:$0xff] }
 0x1ea   : > { %v1752_v4 = vpop.eup %1751  ;;  %v768_v27 = vmul.f32 1.442695, %v705_v11  ;;  %v1227_v13 = vadd.f32 %v1194_v30, %v1161_v42  ;;  %v1197_v53 = vmul.f32 %v1850_v15, %v2819_v16  ;;  %v867_v1 = vmul.f32 1.442695, %v804_v61 }
 0x1eb   : > { %v1754_v36 = vpop.eup %1753  ;;  %1294 = vst [vmem:[%s2578_s3 + $0xc8] sm:$0xff] %v1261_v32  ;;  %1767 = vrcp.f32 %v1031_v35  ;;  %v1001_v31 = vadd.f32 %v1752_v4, %v1750_v40  ;;  %v903_v19 = vsub.f32 %v2815_v5, %v672_v48  ;;  %v707_v62 = vsub.f32 %v3144_v21, %v674_v0 }
 0x1ec   : > { %1769 = vpow2.f32 %v869_v54  ;;  %v1230_v10 = vadd.f32 %v1197_v53, %v1164_v59  ;;  %v1163_v26 = vadd.f32 %v1130_v56, %v1097_v52  ;;  %v1100_v5 = vmul.f32 %v1851_v7, %v1750_v40  ;;  %v1857_v40 = vld [vmem:[%s2027_s30 + $0x2f0] sm:$0xff] }
 0x1ed   : > { %v1756_v17 = vpop.eup %1755  ;;  %v1034_v55 = vadd.f32 %v1754_v36, %v1001_v31  ;;  %1771 = vpow2.f32 %v968_v63  ;;  %v966_v16 = vmul.f32 1.442695, %v903_v19  ;;  %v772_v14 = vmul.f32 1.442695, %v707_v62  ;;  %v1861_v62 = vld [vmem:[%s2027_s30 + $0x1f8] sm:$0xff] }
 0x1ee   : > { %v1758_v50 = vpop.eup %1757  ;;  %v1260_v6 = vmul.f32 %v1756_v17, %v1227_v13  ;;  %1773 = vpow2.f32 %v768_v27  ;;  %v1133_v21 = vmul.f32 %v1852_v41, %v1752_v4  ;;  %v806_v60 = vsub.f32 %v3143_v25, %v674_v0  ;;  %v1855_v25 = vld [vmem:[%s2027_s30 + $0x1e8] sm:$0xff] }
 0x1ef   : > { %v1760_v18 = vpop.eup %1759  ;;  %1775 = vrcp.f32 %v1034_v55  ;;  %v905_v58 = vsub.f32 %v2831_v12, %v674_v0  ;;  %v1196_v20 = vmul.f32 %v1853_v29, %v1746_v33  ;;  %v1099_v8 = vmul.f32 %v1854_v24, %v1758_v50  ;;  %v1866_v29 = vld [vmem:[%s2027_s30 + $0x310] sm:$0xff] }
 0x1f0   : > { %v1762_v43 = vpop.eup %1761  ;;  %1293 = vst [vmem:[%s2578_s3 + $0xc0] sm:$0xff] %v1260_v6  ;;  %v1000_v2 = vadd.f32 %v1760_v18, %v1758_v50  ;;  %1777 = vpow2.f32 %v867_v1  ;;  %v871_v45 = vmul.f32 1.442695, %v806_v60  ;;  %v1166_v22 = vadd.f32 %v1133_v21, %v1100_v5  ;;  %v1860_v1 = vld [vmem:[%s2027_s30 + $0xf0] sm:$0xff]  ;;  %v1865_v21 = vld [vmem:[%s2027_s30 + $0x300] sm:$0xff] }
 0x1f1   : > { %v1764_v28 = vpop.eup %1763  ;;  %v1263_v49 = vmul.f32 %v1762_v43, %v1230_v10  ;;  %1779 = vpow2.f32 %v966_v16  ;;  %v970_v37 = vmul.f32 1.442695, %v905_v58  ;;  %v1229_v34 = vadd.f32 %v1196_v20, %v1163_v26  ;;  %v1862_v10 = vld [vmem:[%s2027_s30 + $0x308] sm:$0xff]  ;;  %v1863_v16 = vld [vmem:[%s2027_s30 + $0x100] sm:$0xff] }
 0x1f2   : > { %v1033_v48 = vadd.f32 %v1764_v28, %v1000_v2  ;;  %1781 = vpow2.f32 %v772_v14  ;;  %v1132_v46 = vmul.f32 %v1855_v25, %v1760_v18  ;;  %v1199_v33 = vmul.f32 %v1856_v57, %v1754_v36  ;;  %v1864_v43 = vld [vmem:[%s2027_s30 + $0x208] sm:$0xff] }
 0x1f3   : > { %1296 = vst [vmem:[%s2578_s3 + $0xd8] sm:$0xff] %v1263_v49  ;;  %v1766_v23 = vpop.eup %1765  ;;  %v1198_v32 = vmul.f32 %v1857_v40, %v1764_v28 }
 0x1f4   : > { %1783 = vrcp.f32 %v1033_v48  ;;  %v1232_v11 = vadd.f32 %v1199_v33, %v1166_v22  ;;  %v1165_v44 = vadd.f32 %v1132_v46, %v1099_v8  ;;  %v1102_v52 = vmul.f32 %v1858_v38, %v1766_v23 }
 0x1f5   : > { %1785 = vpow2.f32 %v871_v45  ;;  %v1768_v12 = vpop.eup %1767 }
 0x1f6   : > { %v1770_v30 = vpop.eup %1769  ;;  %v1262_v3 = vmul.f32 %v1768_v12, %v1229_v34  ;;  %1787 = vpow2.f32 %v970_v37  ;;  %v1231_v4 = vadd.f32 %v1198_v32, %v1165_v44 }
 0x1f7   : > { %v1772_v42 = vpop.eup %1771  ;;  %v1003_v47 = vadd.f32 %v1770_v30, %v1766_v23  ;;  %v1135_v56 = vmul.f32 %v1859_v9, %v1770_v30 }
 0x1f8   : > { %v1774_v39 = vpop.eup %1773  ;;  %1295 = vst [vmem:[%s2578_s3 + $0xd0] sm:$0xff] %v1262_v3  ;;  %v1201_v55 = vmul.f32 %v1862_v10, %v1772_v42 }
 0x1f9   : > { %v1776_v51 = vpop.eup %1775  ;;  %v1036_v54 = vadd.f32 %v1772_v42, %v1003_v47  ;;  %v1168_v17 = vadd.f32 %v1135_v56, %v1102_v52  ;;  %v1101_v19 = vmul.f32 %v1860_v1, %v1774_v39 }
 0x1fa   : > { %v1778_v61 = vpop.eup %1777  ;;  %v1265_v0 = vmul.f32 %v1776_v51, %v1232_v11 }
 0x1fb   : > { %v1780_v59 = vpop.eup %1779  ;;  %1789 = vrcp.f32 %v1036_v54  ;;  %v1002_v35 = vadd.f32 %v1778_v61, %v1774_v39  ;;  %v1134_v50 = vmul.f32 %v1861_v62, %v1778_v61  ;;  %v1234_v18 = vadd.f32 %v1201_v55, %v1168_v17 }
 0x1fc   : > { %v1782_v63 = vpop.eup %1781  ;;  %1298 = vst [vmem:[%s2578_s3 + $0xe8] sm:$0xff] %v1265_v0  ;;  %v1200_v2 = vmul.f32 %v1865_v21, %v1780_v59 }
 0x1fd   : > { %v1035_v36 = vadd.f32 %v1780_v59, %v1002_v35  ;;  %v1167_v26 = vadd.f32 %v1134_v50, %v1101_v19  ;;  %v1103_v14 = vmul.f32 %v1863_v16, %v1782_v63 }
 0x1fe   : > { %v1784_v27 = vpop.eup %1783 }
 0x1ff   : > { %v1786_v13 = vpop.eup %1785  ;;  %v1264_v15 = vmul.f32 %v1784_v27, %v1231_v4  ;;  %1791 = vrcp.f32 %v1035_v36  ;;  %v1233_v28 = vadd.f32 %v1200_v2, %v1167_v26 }
 0x200   : > { %v1004_v53 = vadd.f32 %v1786_v13, %v1782_v63  ;;  %v1788_v31 = vpop.eup %1787  ;;  %v1136_v7 = vmul.f32 %v1864_v43, %v1786_v13 }
 0x201   : > { %1297 = vst [vmem:[%s2578_s3 + $0xe0] sm:$0xff] %v1264_v15  ;;  %v1202_v20 = vmul.f32 %v1866_v29, %v1788_v31 }
 0x202   : > { %v1037_v6 = vadd.f32 %v1788_v31, %v1004_v53  ;;  %v1169_v49 = vadd.f32 %v1136_v7, %v1103_v14 }
 0x204   : > { %1793 = vrcp.f32 %v1037_v6  ;;  %v1235_v48 = vadd.f32 %v1202_v20, %v1169_v49 }
 0x205   : > { %v1790_v5 = vpop.eup %1789 }
 0x206   : > { %v1267_v41 = vmul.f32 %v1790_v5, %v1234_v18 }
 0x208   : > { %1300 = vst [vmem:[%s2578_s3 + $0xf8] sm:$0xff] %v1267_v41 }
 0x209   : > { %v1792_v60 = vpop.eup %1791 }
 0x20a   : > { %v1266_v58 = vmul.f32 %v1792_v60, %v1233_v28 }
 0x20b   : > { %1309 = sbr.rel (!%p2002_p9) target bundleno = 558 (0x22e), region = 36 }
 0x20c   : > { %1299 = vst [vmem:[%s2578_s3 + $0xf0] sm:$0xff] %v1266_v58 }
 0x20e   : > { %v1794_v45 = vpop.eup %1793 }
 0x20f   : > { %v1268_v37 = vmul.f32 %v1794_v45, %v1235_v48 }
 0x211   : > { %1301 = vst [vmem:[%s2578_s3 + $0x100] sm:$0xff] %v1268_v37 }
 0x212   : > { %s3154_s6 = smov (!%p1312_p3, %s1311_s6), 33 }
 0x213   : > { %s2876_s7 = sshll.u32 %s3154_s6, 7 }
 0x214   : > { %s1316_s8 = ssub.s32 4224, %s2876_s7 }
 0x215   : > { %1317 = vsyncadd %s1303_s4, %s1316_s8  ;;  %p1474_p4 = scmp.ne.s32.totalorder %s2876_s7, 0  ;;  %s1481_s20 = smul.u32 4224, %s1979_s13 }
 0x216   : > { %s1322_s14 = sshll.u32 %s2578_s3, 4  ;;  %s1940_s24 = smov [#allocation5]   ;;  %s2889_s14 = int_to_ptr.vmem [resolvable:$true] %s1322_s14 }
 0x217   : > { %s2887_s22 = scalar_lea.hbm %s2937_s2, %s1481_s20  ;;  %s1867_s23 = scalar_lea.vmem %s2889_s14, %s2876_s7 }
 0x218   : > { %p1868_p5 = scmp.ne.s32.totalorder %s2889_s14, %s1867_s23  ;;  %s1871_s27 = sshll.u32 %s1940_s24, 4  ;;  %s1872_s27 = int_to_ptr.vmem [resolvable:$false] %s1871_s27 }
 0x219   : > { %s1873_s13 = scalar_lea.vmem %s1872_s27, 8448  ;;  %p1874_p8 = scmp.lt.s32.totalorder %s2889_s14, %s1872_s27 }
 0x21a   : > { %p1869_p6 = pnand %p1868_p5, %p1474_p4  ;;  %p1875_p9 = scmp.lt.s32.totalorder %s1873_s13, %s1867_s23 }
 0x21c   : > { %p1870_p7 = pneg %p1869_p6  ;;  %p1876_p12 = por %p1875_p9, %p1874_p8 }
 0x21e   : > { %p1877_p13 = pnand %p1876_p12, %p1870_p7 }
 0x220   : > { %1880 = shalt.err (!%p1877_p13)
}
 0x221   : > { %s1881_s29 = scalar_lea.hbm %s2887_s22, %s2876_s7  ;;  %s1885_s28 = scalar_lea.hbm %s2937_s2, 8320 }
 0x222   : > { %p1882_p0 = scmp.ne.s32.totalorder %s2887_s22, %s1881_s29  ;;  %p1886_p3 = scmp.lt.u32.totalorder %s2887_s22, %s2937_s2 }
 0x223   : > { %p1887_p5 = scmp.lt.u32.totalorder %s1885_s28, %s1881_s29  ;;  %p1889_p7 = scmp.lt.u32.totalorder %s1881_s29, %s2887_s22 }
 0x224   : > { %p1883_p1 = pnand %p1882_p0, %p1474_p4 }
 0x225   : > { %p1888_p6 = por %p1887_p5, %p1886_p3 }
 0x226   : > { %p1884_p2 = pneg %p1883_p1 }
 0x227   : > { %p1890_p8 = por %p1889_p7, %p1888_p6 }
 0x229   : > { %p1891_p9 = pnand %p1890_p8, %p1884_p2 }
 0x22b   : > { %1894 = shalt.err (!%p1891_p9)
}
 0x22c   : > { %s1941_s5 = smov 128   ;;  %s1942_s6 = smov 8  }
 0x22d   : > { %1328 = dma.vmem_to_hbm [thread:$0]  (%p1474_p4), %s2889_s14, %s2876_s7, %s2887_s22, %s1303_s4, %s1941_s5, %s1941_s5, %s1942_s6  }
 0x22e PF: > { %s1337_s8 = sand.u32 1, %s1921_s9   ;;  %p1488_p12 = pnand %p1397_p11, %p2006_p10 }
 0x22f   : > { %s1338_s20 = scalar_lea.sflag [#allocation4], %s1337_s8 }
 0x230   : > { %1916 = dma.done.wait (!%p1488_p12), %s1338_s20, 4224  }
 0x231   : > { %1918 = vsyncadd (!%p1488_p12), %s1338_s20, 4294963072  ;;  %p15_p13 = scmp.ge.s32.totalorder %s1983_s15, 4   ;;  %s3147_s9 = smov %s1925_s10 }
 0x232   : > { %s3148_s10 = smov %s1929_s11  ;;  %s3149_s11 = smov %s1995_s18 }
 0x233   : > { %s3150_s12 = smov %s1983_s15  ;;  %17 = sbr.rel (!%p15_p13) target bundleno = 5 (0x5), region = 80 }
 0x23a   :  { %1343 = vsyncpa [#allocation3], 1 }
 0x23b   :  { %1345 = vsyncpa [#allocation3 + $0x1], 1 }
 0x23c   :  { %1346 = vsyncpa [#allocation4], 1 }
 0x23d   :  { %1348 = vsyncpa [#allocation4 + $0x1], 1 }

</bundles_post_ra>
